<compile_context>
chip_gen: v5e
topology: v5e:2x2
jax: 0.10.0
libtpu: 0.0.40
codegen_flags: <defaults>
</compile_context>

<pallas_src>
import functools

import jax
import jax.numpy as jnp
from jax import lax
from jax.experimental import pallas as pl
from jax.experimental.pallas import tpu as pltpu

D_MODEL = 32
N_HEADS = 4
D_K = D_MODEL // N_HEADS
D_FF = 64
EPS = 1e-6
NEG_BIG = 1e9


def decoder_layer_kernel(x_ref, mem_ref, tmask_ref, smask_ref,
                         bd_t_ref, ones_t_ref, bd_s_ref, ones_s_ref,
                         w_self_qkv_ref, b_self_qkv_ref, w_self_o_ref, b_self_o_ref,
                         w_src_q_ref, b_src_q_ref, w_src_kv_ref, b_src_kv_ref,
                         w_src_o_ref, b_src_o_ref,
                         w1_ref, b1_ref, w2_ref, b2_ref,
                         ln_a_ref, ln_b_ref,
                         out_ref,
                         s_self_scr, s_src_scr, o_scr,
                         *, nb, tq, tk_self, tk_src):
    """Single program: the whole (nb, tq) batch flattened to (nb*tq, D) rows."""
    x = x_ref[...]            # (nb*tq, D)
    mem = mem_ref[...]        # (nb*tk_src, D)
    scale = 1.0 / (D_K ** 0.5)

    def layer_norm(z, idx):
        a = ln_a_ref[idx:idx + 1, :]            # (1, D), read once per call
        b = ln_b_ref[idx:idx + 1, :]
        mean = jnp.mean(z, axis=-1, keepdims=True)
        zc = z - mean
        # torch's x.std(-1) is unbiased (divides by D-1)
        var = jnp.sum(zc * zc, axis=-1, keepdims=True) * (1.0 / (D_MODEL - 1))
        inv = pl.reciprocal(jnp.sqrt(var) + EPS, approx=False)   # EUP, off the VALU
        return a * zc * inv + b

    def block_diag(rows, bd_mask, t_k):
        # (t_k, D) -> (N_HEADS*t_k, D): replicate along sublanes (one broadcast),
        # keep only each head's lanes (one VPU multiply by a constant selector).
        rep = jnp.broadcast_to(rows[None, :, :], (N_HEADS, t_k, D_MODEL))
        return rep.reshape(N_HEADS * t_k, D_MODEL) * bd_mask

    def attention(q, k, v, add_mask, bd_mask, ones_bd, w_o, b_o, t_k, s_scr):
        # q: (nb*tq, D), pre-scaled by 1/sqrt(d_k); k, v: (nb*t_k, D).
        # add_mask: (nb*tq, N_HEADS*t_k) additive mask already in the scores layout.
        # Scores layout: row = b*tq + qi, lane = h*t_k + ki  (heads along lanes).
        v_bigs = []
        for b in range(nb):                              # static unroll over batch only
            kb = k[b * t_k:(b + 1) * t_k, :]
            vb = v[b * t_k:(b + 1) * t_k, :]
            k_big = block_diag(kb, bd_mask, t_k)          # (N_HEADS*t_k, D)
            v_bigs.append(block_diag(vb, bd_mask, t_k))
            qb = q[b * tq:(b + 1) * tq, :]
            # Contract the shared last dim: MXU takes K transposed, no explicit k.T.
            s_scr[b * tq:(b + 1) * tq, :] = lax.dot_general(
                qb, k_big, (((1,), (1,)), ((), ())),
                preferred_element_type=jnp.float32)
        s = s_scr[...] + add_mask                         # single additive-mask add
        # Batched softmax over all (batch, head, query) rows.  A per-row max across all
        # heads is a valid stabilizer; per-head normalization comes from ones_bd below.
        m = jnp.max(s, axis=-1, keepdims=True)
        e = jnp.exp(s - m)
        denom = jnp.dot(e, ones_bd, preferred_element_type=jnp.float32)  # per-head sums
        p = e * pl.reciprocal(denom, approx=False)
        for b in range(nb):
            o_scr[b * tq:(b + 1) * tq, :] = jnp.dot(
                p[b * tq:(b + 1) * tq, :], v_bigs[b],
                preferred_element_type=jnp.float32)
        return jnp.dot(o_scr[...], w_o, preferred_element_type=jnp.float32) + b_o

    # ---- sublayer[0]: masked self-attention (fused QKV projection) ----
    n0 = layer_norm(x, 0)
    qkv = jnp.dot(n0, w_self_qkv_ref[...],
                  preferred_element_type=jnp.float32) + b_self_qkv_ref[...]
    q = qkv[:, 0:D_MODEL] * scale
    k = qkv[:, D_MODEL:2 * D_MODEL]
    v = qkv[:, 2 * D_MODEL:3 * D_MODEL]
    x1 = x + attention(q, k, v, tmask_ref[...], bd_t_ref[...], ones_t_ref[...],
                       w_self_o_ref[...], b_self_o_ref[...], tk_self, s_self_scr)

    # ---- sublayer[1]: cross-attention over encoder memory (fused KV projection) ----
    n1 = layer_norm(x1, 1)
    q = (jnp.dot(n1, w_src_q_ref[...],
                 preferred_element_type=jnp.float32) + b_src_q_ref[...]) * scale
    kv = jnp.dot(mem, w_src_kv_ref[...],
                 preferred_element_type=jnp.float32) + b_src_kv_ref[...]
    k = kv[:, 0:D_MODEL]
    v = kv[:, D_MODEL:2 * D_MODEL]
    x2 = x1 + attention(q, k, v, smask_ref[...], bd_s_ref[...], ones_s_ref[...],
                        w_src_o_ref[...], b_src_o_ref[...], tk_src, s_src_scr)

    # ---- sublayer[2]: position-wise feed-forward ----
    n2 = layer_norm(x2, 2)
    h = jnp.maximum(
        jnp.dot(n2, w1_ref[...], preferred_element_type=jnp.float32) + b1_ref[...], 0.0)
    out_ref[...] = x2 + jnp.dot(h, w2_ref[...],
                                preferred_element_type=jnp.float32) + b2_ref[...]


def _head_block_mask(tk, ncols, col_div):
    """(N_HEADS*tk, ncols) 0/1 selector: 1 where row-head == column-head."""
    r = (jnp.arange(N_HEADS * tk) // tk)[:, None]
    c = (jnp.arange(ncols) // col_div)[None, :]
    return (r == c).astype(jnp.float32)


def decoder_layer(x, memory, tgt_mask, src_mask, params):
    B, T, D = x.shape
    S = memory.shape[1]
    assert D == D_MODEL

    # ---- one-time wrapper-side packing (weights, masks, block-diag selectors) ----
    w_self, b_self = params["w_self"], params["b_self"]
    w_src, b_src = params["w_src"], params["b_src"]
    w_self_qkv = jnp.concatenate([w_self[0], w_self[1], w_self[2]], axis=1)   # (D, 3D)
    b_self_qkv = jnp.concatenate([b_self[0], b_self[1], b_self[2]])[None, :]  # (1, 3D)
    w_self_o, b_self_o = w_self[3], b_self[3][None, :]
    w_src_q, b_src_q = w_src[0], b_src[0][None, :]
    w_src_kv = jnp.concatenate([w_src[1], w_src[2]], axis=1)                  # (D, 2D)
    b_src_kv = jnp.concatenate([b_src[1], b_src[2]])[None, :]                 # (1, 2D)
    w_src_o, b_src_o = w_src[3], b_src[3][None, :]

    # Additive masks, pre-expanded to the in-kernel scores layout
    # (row = b*T + q, lane = h*tk + k): the kernel only does one add per attention.
    tadd = jnp.where(tgt_mask == 0.0, -NEG_BIG, 0.0)                          # (B, T, T)
    tadd = jnp.tile(tadd, (1, 1, N_HEADS)).reshape(B * T, N_HEADS * T)
    sadd = jnp.broadcast_to(jnp.where(src_mask == 0.0, -NEG_BIG, 0.0), (B, T, S))
    sadd = jnp.tile(sadd, (1, 1, N_HEADS)).reshape(B * T, N_HEADS * S)

    # Block-diagonal head selectors: bd_* expands K/V to block-diagonal form,
    # ones_* computes per-head softmax denominators with a single MXU dot.
    bd_t = _head_block_mask(T, D_MODEL, D_K)            # (N_HEADS*T, D)
    ones_t = _head_block_mask(T, N_HEADS * T, T)        # (N_HEADS*T, N_HEADS*T)
    bd_s = _head_block_mask(S, D_MODEL, D_K)            # (N_HEADS*S, D)
    ones_s = _head_block_mask(S, N_HEADS * S, S)        # (N_HEADS*S, N_HEADS*S)

    x2d = x.reshape(B * T, D)
    mem2d = memory.reshape(B * S, D)

    kern = functools.partial(decoder_layer_kernel, nb=B, tq=T, tk_self=T, tk_src=S)

    # Single fat program (no grid): at these shapes per-program overhead and duplicate
    # weight DMAs dominate any multi-core split.  A flash-style query-tile grid with an
    # "arbitrary" kv axis, bf16 matmul operands and vmem_limit_bytes are the scale-up
    # levers (see review) and are intentionally not applied at toy size.
    out2d = pl.pallas_call(
        kern,
        out_shape=jax.ShapeDtypeStruct((B * T, D), jnp.float32),
        scratch_shapes=[
            pltpu.VMEM((B * T, N_HEADS * T), jnp.float32),   # self-attn scores
            pltpu.VMEM((B * T, N_HEADS * S), jnp.float32),   # cross-attn scores
            pltpu.VMEM((B * T, D), jnp.float32),             # per-batch attention output
        ],
    )(x2d, mem2d, tadd, sadd, bd_t, ones_t, bd_s, ones_s,
      w_self_qkv, b_self_qkv, w_self_o, b_self_o,
      w_src_q, b_src_q, w_src_kv, b_src_kv, w_src_o, b_src_o,
      params["w1"], params["b1"], params["w2"], params["b2"],
      params["ln_a"], params["ln_b"])
    return out2d.reshape(B, T, D)


def reference(x, memory, tgt_mask, src_mask, p):
    """Pure-JAX reference mirroring the PyTorch DecoderLayer forward (eval mode)."""
    def ln(z, a, b):
        mean = z.mean(-1, keepdims=True)
        var = ((z - mean) ** 2).sum(-1, keepdims=True) / (z.shape[-1] - 1)
        std = jnp.sqrt(var)
        return a * (z - mean) / (std + EPS) + b

    def mha(q_in, kv_in, mask, W, Bv):
        q = q_in @ W[0] + Bv[0]
        k = kv_in @ W[1] + Bv[1]
        v = kv_in @ W[2] + Bv[2]
        B_, Tq, _ = q.shape
        Tk = k.shape[1]
        qh = q.reshape(B_, Tq, N_HEADS, D_K).transpose(0, 2, 1, 3)
        kh = k.reshape(B_, Tk, N_HEADS, D_K).transpose(0, 2, 1, 3)
        vh = v.reshape(B_, Tk, N_HEADS, D_K).transpose(0, 2, 1, 3)
        scores = jnp.einsum("bhqd,bhkd->bhqk", qh, kh) / (D_K ** 0.5)
        scores = jnp.where(mask[:, None, :, :] == 0.0, -1e9, scores)
        pa = jax.nn.softmax(scores, axis=-1)
        o = jnp.einsum("bhqk,bhkd->bhqd", pa, vh).transpose(0, 2, 1, 3).reshape(B_, Tq, -1)
        return o @ W[3] + Bv[3]

    n0 = ln(x, p["ln_a"][0], p["ln_b"][0])
    x1 = x + mha(n0, n0, tgt_mask, p["w_self"], p["b_self"])
    n1 = ln(x1, p["ln_a"][1], p["ln_b"][1])
    x2 = x1 + mha(n1, memory, src_mask, p["w_src"], p["b_src"])
    n2 = ln(x2, p["ln_a"][2], p["ln_b"][2])
    ff = jnp.maximum(n2 @ p["w1"] + p["b1"], 0.0) @ p["w2"] + p["b2"]
    return x2 + ff


if __name__ == "__main__":
    B, T, S = 2, 8, 8
    key = jax.random.PRNGKey(0)
    ks = jax.random.split(key, 12)

    params = {
        "w_self": (jax.random.normal(ks[0], (4, D_MODEL, D_MODEL)) * 0.1).astype(jnp.float32),
        "b_self": (jax.random.normal(ks[1], (4, D_MODEL)) * 0.01).astype(jnp.float32),
        "w_src": (jax.random.normal(ks[2], (4, D_MODEL, D_MODEL)) * 0.1).astype(jnp.float32),
        "b_src": (jax.random.normal(ks[3], (4, D_MODEL)) * 0.01).astype(jnp.float32),
        "w1": (jax.random.normal(ks[4], (D_MODEL, D_FF)) * 0.1).astype(jnp.float32),
        "b1": (jax.random.normal(ks[5], (1, D_FF)) * 0.01).astype(jnp.float32),
        "w2": (jax.random.normal(ks[6], (D_FF, D_MODEL)) * 0.1).astype(jnp.float32),
        "b2": (jax.random.normal(ks[7], (1, D_MODEL)) * 0.01).astype(jnp.float32),
        "ln_a": (1.0 + 0.1 * jax.random.normal(ks[8], (3, D_MODEL))).astype(jnp.float32),
        "ln_b": (0.1 * jax.random.normal(ks[9], (3, D_MODEL))).astype(jnp.float32),
    }

    x = jax.random.normal(ks[10], (B, T, D_MODEL), dtype=jnp.float32)
    memory = jax.random.normal(ks[11], (B, S, D_MODEL), dtype=jnp.float32)
    tgt_mask = jnp.broadcast_to(jnp.tril(jnp.ones((T, T), jnp.float32)), (B, T, T))
    src_mask = jnp.ones((B, 1, S), jnp.float32)

    ref = reference(x, memory, tgt_mask, src_mask, params)

    out = decoder_layer(x, memory, tgt_mask, src_mask, params)
    out = jax.block_until_ready(out)
    assert out.shape == (B, T, D_MODEL)
    assert jnp.allclose(out, ref, atol=1e-4, rtol=1e-4), "mismatch vs pure-JAX reference"

    print("KERNEL_OK")
</pallas_src>

<mosaic_0001>
module attributes {stable_mosaic.version = 11 : i64} {
  func.func @decoder_layer_kernel(%arg0: memref<16x32xf32, #tpu.memory_space<vmem>>, %arg1: memref<16x32xf32, #tpu.memory_space<vmem>>, %arg2: memref<16x32xf32, #tpu.memory_space<vmem>>, %arg3: memref<16x32xf32, #tpu.memory_space<vmem>>, %arg4: memref<32x32xf32, #tpu.memory_space<vmem>>, %arg5: memref<32x32xf32, #tpu.memory_space<vmem>>, %arg6: memref<32x32xf32, #tpu.memory_space<vmem>>, %arg7: memref<32x32xf32, #tpu.memory_space<vmem>>, %arg8: memref<32x96xf32, #tpu.memory_space<vmem>>, %arg9: memref<1x96xf32, #tpu.memory_space<vmem>>, %arg10: memref<32x32xf32, #tpu.memory_space<vmem>>, %arg11: memref<1x32xf32, #tpu.memory_space<vmem>>, %arg12: memref<32x32xf32, #tpu.memory_space<vmem>>, %arg13: memref<1x32xf32, #tpu.memory_space<vmem>>, %arg14: memref<32x64xf32, #tpu.memory_space<vmem>>, %arg15: memref<1x64xf32, #tpu.memory_space<vmem>>, %arg16: memref<32x32xf32, #tpu.memory_space<vmem>>, %arg17: memref<1x32xf32, #tpu.memory_space<vmem>>, %arg18: memref<32x64xf32, #tpu.memory_space<vmem>>, %arg19: memref<1x64xf32, #tpu.memory_space<vmem>>, %arg20: memref<64x32xf32, #tpu.memory_space<vmem>>, %arg21: memref<1x32xf32, #tpu.memory_space<vmem>>, %arg22: memref<3x32xf32, #tpu.memory_space<vmem>>, %arg23: memref<3x32xf32, #tpu.memory_space<vmem>>, %arg24: memref<16x32xf32, #tpu.memory_space<vmem>>, %arg25: memref<16x32xf32, #tpu.memory_space<vmem>>, %arg26: memref<16x32xf32, #tpu.memory_space<vmem>>, %arg27: memref<16x32xf32, #tpu.memory_space<vmem>>) attributes {dimension_semantics = [], scalar_prefetch = 0 : i64, scratch_operands = 3 : i64, tpu.core_type = #tpu.core_type<tc>} {
    %c0 = arith.constant 0 : index
    %c0_0 = arith.constant 0 : index
    %0 = vector.load %arg0[%c0, %c0_0] : memref<16x32xf32, #tpu.memory_space<vmem>>, vector<16x32xf32>
    %c0_1 = arith.constant 0 : index
    %c0_2 = arith.constant 0 : index
    %1 = vector.load %arg1[%c0_1, %c0_2] : memref<16x32xf32, #tpu.memory_space<vmem>>, vector<16x32xf32>
    %c0_3 = arith.constant 0 : index
    %c0_4 = arith.constant 0 : index
    %2 = vector.load %arg22[%c0_3, %c0_4] : memref<3x32xf32, #tpu.memory_space<vmem>>, vector<1x32xf32>
    %c0_5 = arith.constant 0 : index
    %c0_6 = arith.constant 0 : index
    %3 = vector.load %arg23[%c0_5, %c0_6] : memref<3x32xf32, #tpu.memory_space<vmem>>, vector<1x32xf32>
    %cst = arith.constant dense<0.000000e+00> : vector<16xf32>
    %4 = vector.multi_reduction <add>, %0, %cst [1] : vector<16x32xf32> to vector<16xf32>
    %5 = vector.shape_cast %4 : vector<16xf32> to vector<16x1xf32>
    %cst_7 = arith.constant 3.200000e+01 : f32
    %6 = vector.broadcast %cst_7 : f32 to vector<16x1xf32>
    %7 = arith.divf %5, %6 : vector<16x1xf32>
    %8 = vector.broadcast %7 : vector<16x1xf32> to vector<16x32xf32>
    %9 = arith.subf %0, %8 : vector<16x32xf32>
    %10 = arith.mulf %9, %9 : vector<16x32xf32>
    %cst_8 = arith.constant dense<0.000000e+00> : vector<16xf32>
    %11 = vector.multi_reduction <add>, %10, %cst_8 [1] : vector<16x32xf32> to vector<16xf32>
    %12 = vector.shape_cast %11 : vector<16xf32> to vector<16x1xf32>
    %cst_9 = arith.constant 0.0322580636 : f32
    %13 = vector.broadcast %cst_9 : f32 to vector<16x1xf32>
    %14 = arith.mulf %12, %13 : vector<16x1xf32>
    %15 = math.sqrt %14 : vector<16x1xf32>
    %cst_10 = arith.constant 9.99999997E-7 : f32
    %16 = vector.broadcast %cst_10 : f32 to vector<16x1xf32>
    %17 = arith.addf %15, %16 : vector<16x1xf32>
    %18 = tpu.reciprocal %17 : vector<16x1xf32> -> vector<16x1xf32>
    %19 = vector.broadcast %2 : vector<1x32xf32> to vector<16x32xf32>
    %20 = arith.mulf %19, %9 : vector<16x32xf32>
    %21 = vector.broadcast %18 : vector<16x1xf32> to vector<16x32xf32>
    %22 = arith.mulf %20, %21 : vector<16x32xf32>
    %23 = vector.broadcast %3 : vector<1x32xf32> to vector<16x32xf32>
    %24 = arith.addf %22, %23 : vector<16x32xf32>
    %c0_11 = arith.constant 0 : index
    %c0_12 = arith.constant 0 : index
    %25 = vector.load %arg8[%c0_11, %c0_12] : memref<32x96xf32, #tpu.memory_space<vmem>>, vector<32x96xf32>
    %cst_13 = arith.constant dense<0.000000e+00> : vector<16x96xf32>
    %26 = tpu.matmul %24, %25, %cst_13 {dimension_numbers = #tpu.dot_dimension_numbers<[1], [0], [0], [1], [0, 0, 1, 1], [], []>} : vector<16x32xf32>, vector<32x96xf32>, vector<16x96xf32> -> vector<16x96xf32>
    %c0_14 = arith.constant 0 : index
    %c0_15 = arith.constant 0 : index
    %27 = vector.load %arg9[%c0_14, %c0_15] : memref<1x96xf32, #tpu.memory_space<vmem>>, vector<1x96xf32>
    %28 = vector.broadcast %27 : vector<1x96xf32> to vector<16x96xf32>
    %29 = arith.addf %26, %28 : vector<16x96xf32>
    %30 = vector.extract_strided_slice %29 {offsets = [0, 0], sizes = [16, 32], strides = [1, 1]} : vector<16x96xf32> to vector<16x32xf32>
    %cst_16 = arith.constant 0.353553385 : f32
    %31 = vector.broadcast %cst_16 : f32 to vector<16x32xf32>
    %32 = arith.mulf %30, %31 : vector<16x32xf32>
    %33 = vector.extract_strided_slice %29 {offsets = [0, 32], sizes = [16, 32], strides = [1, 1]} : vector<16x96xf32> to vector<16x32xf32>
    %34 = vector.extract_strided_slice %29 {offsets = [0, 64], sizes = [16, 32], strides = [1, 1]} : vector<16x96xf32> to vector<16x32xf32>
    %c0_17 = arith.constant 0 : index
    %c0_18 = arith.constant 0 : index
    %35 = vector.load %arg2[%c0_17, %c0_18] : memref<16x32xf32, #tpu.memory_space<vmem>>, vector<16x32xf32>
    %c0_19 = arith.constant 0 : index
    %c0_20 = arith.constant 0 : index
    %36 = vector.load %arg4[%c0_19, %c0_20] : memref<32x32xf32, #tpu.memory_space<vmem>>, vector<32x32xf32>
    %c0_21 = arith.constant 0 : index
    %c0_22 = arith.constant 0 : index
    %37 = vector.load %arg5[%c0_21, %c0_22] : memref<32x32xf32, #tpu.memory_space<vmem>>, vector<32x32xf32>
    %c0_23 = arith.constant 0 : index
    %c0_24 = arith.constant 0 : index
    %38 = vector.load %arg10[%c0_23, %c0_24] : memref<32x32xf32, #tpu.memory_space<vmem>>, vector<32x32xf32>
    %c0_25 = arith.constant 0 : index
    %c0_26 = arith.constant 0 : index
    %39 = vector.load %arg11[%c0_25, %c0_26] : memref<1x32xf32, #tpu.memory_space<vmem>>, vector<1x32xf32>
    %40 = vector.extract_strided_slice %33 {offsets = [0, 0], sizes = [8, 32], strides = [1, 1]} : vector<16x32xf32> to vector<8x32xf32>
    %41 = vector.extract_strided_slice %34 {offsets = [0, 0], sizes = [8, 32], strides = [1, 1]} : vector<16x32xf32> to vector<8x32xf32>
    %42 = vector.shape_cast %40 : vector<8x32xf32> to vector<1x8x32xf32>
    %43 = vector.shape_cast %42 : vector<1x8x32xf32> to vector<1x8x32xf32>
    %44 = vector.broadcast %43 : vector<1x8x32xf32> to vector<4x8x32xf32>
    %45 = vector.shape_cast %44 : vector<4x8x32xf32> to vector<32x32xf32>
    %46 = arith.mulf %45, %36 : vector<32x32xf32>
    %47 = vector.shape_cast %41 : vector<8x32xf32> to vector<1x8x32xf32>
    %48 = vector.shape_cast %47 : vector<1x8x32xf32> to vector<1x8x32xf32>
    %49 = vector.broadcast %48 : vector<1x8x32xf32> to vector<4x8x32xf32>
    %50 = vector.shape_cast %49 : vector<4x8x32xf32> to vector<32x32xf32>
    %51 = arith.mulf %50, %36 : vector<32x32xf32>
    %52 = vector.extract_strided_slice %32 {offsets = [0, 0], sizes = [8, 32], strides = [1, 1]} : vector<16x32xf32> to vector<8x32xf32>
    %cst_27 = arith.constant dense<0.000000e+00> : vector<8x32xf32>
    %53 = tpu.matmul %52, %46, %cst_27 {dimension_numbers = #tpu.dot_dimension_numbers<[1], [1], [0], [0], [0, 0, 1, 0], [], []>} : vector<8x32xf32>, vector<32x32xf32>, vector<8x32xf32> -> vector<8x32xf32>
    %c0_28 = arith.constant 0 : index
    %c0_29 = arith.constant 0 : index
    %54 = vector.load %arg25[%c0_28, %c0_29] : memref<16x32xf32, #tpu.memory_space<vmem>>, vector<8x32xf32>
    tpu.vector_store %arg25[%c0_28, %c0_29], %53 {strides = array<i32>} : memref<16x32xf32, #tpu.memory_space<vmem>>, vector<8x32xf32>,
    %55 = vector.extract_strided_slice %33 {offsets = [8, 0], sizes = [8, 32], strides = [1, 1]} : vector<16x32xf32> to vector<8x32xf32>
    %56 = vector.extract_strided_slice %34 {offsets = [8, 0], sizes = [8, 32], strides = [1, 1]} : vector<16x32xf32> to vector<8x32xf32>
    %57 = vector.shape_cast %55 : vector<8x32xf32> to vector<1x8x32xf32>
    %58 = vector.shape_cast %57 : vector<1x8x32xf32> to vector<1x8x32xf32>
    %59 = vector.broadcast %58 : vector<1x8x32xf32> to vector<4x8x32xf32>
    %60 = vector.shape_cast %59 : vector<4x8x32xf32> to vector<32x32xf32>
    %61 = arith.mulf %60, %36 : vector<32x32xf32>
    %62 = vector.shape_cast %56 : vector<8x32xf32> to vector<1x8x32xf32>
    %63 = vector.shape_cast %62 : vector<1x8x32xf32> to vector<1x8x32xf32>
    %64 = vector.broadcast %63 : vector<1x8x32xf32> to vector<4x8x32xf32>
    %65 = vector.shape_cast %64 : vector<4x8x32xf32> to vector<32x32xf32>
    %66 = arith.mulf %65, %36 : vector<32x32xf32>
    %67 = vector.extract_strided_slice %32 {offsets = [8, 0], sizes = [8, 32], strides = [1, 1]} : vector<16x32xf32> to vector<8x32xf32>
    %cst_30 = arith.constant dense<0.000000e+00> : vector<8x32xf32>
    %68 = tpu.matmul %67, %61, %cst_30 {dimension_numbers = #tpu.dot_dimension_numbers<[1], [1], [0], [0], [0, 0, 1, 0], [], []>} : vector<8x32xf32>, vector<32x32xf32>, vector<8x32xf32> -> vector<8x32xf32>
    %c8 = arith.constant 8 : index
    %c0_31 = arith.constant 0 : index
    %69 = vector.load %arg25[%c8, %c0_31] : memref<16x32xf32, #tpu.memory_space<vmem>>, vector<8x32xf32>
    tpu.vector_store %arg25[%c8, %c0_31], %68 {strides = array<i32>} : memref<16x32xf32, #tpu.memory_space<vmem>>, vector<8x32xf32>,
    %c0_32 = arith.constant 0 : index
    %c0_33 = arith.constant 0 : index
    %70 = vector.load %arg25[%c0_32, %c0_33] : memref<16x32xf32, #tpu.memory_space<vmem>>, vector<16x32xf32>
    %71 = arith.addf %70, %35 : vector<16x32xf32>
    %cst_34 = arith.constant dense<0xFF800000> : vector<16xf32>
    %72 = vector.multi_reduction <maximumf>, %71, %cst_34 [1] : vector<16x32xf32> to vector<16xf32>
    %73 = vector.shape_cast %72 : vector<16xf32> to vector<16x1xf32>
    %74 = vector.broadcast %73 : vector<16x1xf32> to vector<16x32xf32>
    %75 = arith.subf %71, %74 : vector<16x32xf32>
    %76 = math.exp %75 : vector<16x32xf32>
    %cst_35 = arith.constant dense<0.000000e+00> : vector<16x32xf32>
    %77 = tpu.matmul %76, %37, %cst_35 {dimension_numbers = #tpu.dot_dimension_numbers<[1], [0], [0], [1], [0, 0, 1, 1], [], []>} : vector<16x32xf32>, vector<32x32xf32>, vector<16x32xf32> -> vector<16x32xf32>
    %78 = tpu.reciprocal %77 : vector<16x32xf32> -> vector<16x32xf32>
    %79 = arith.mulf %76, %78 : vector<16x32xf32>
    %80 = vector.extract_strided_slice %79 {offsets = [0, 0], sizes = [8, 32], strides = [1, 1]} : vector<16x32xf32> to vector<8x32xf32>
    %cst_36 = arith.constant dense<0.000000e+00> : vector<8x32xf32>
    %81 = tpu.matmul %80, %51, %cst_36 {dimension_numbers = #tpu.dot_dimension_numbers<[1], [0], [0], [1], [0, 0, 1, 1], [], []>} : vector<8x32xf32>, vector<32x32xf32>, vector<8x32xf32> -> vector<8x32xf32>
    %c0_37 = arith.constant 0 : index
    %c0_38 = arith.constant 0 : index
    %82 = vector.load %arg27[%c0_37, %c0_38] : memref<16x32xf32, #tpu.memory_space<vmem>>, vector<8x32xf32>
    tpu.vector_store %arg27[%c0_37, %c0_38], %81 {strides = array<i32>} : memref<16x32xf32, #tpu.memory_space<vmem>>, vector<8x32xf32>,
    %83 = vector.extract_strided_slice %79 {offsets = [8, 0], sizes = [8, 32], strides = [1, 1]} : vector<16x32xf32> to vector<8x32xf32>
    %cst_39 = arith.constant dense<0.000000e+00> : vector<8x32xf32>
    %84 = tpu.matmul %83, %66, %cst_39 {dimension_numbers = #tpu.dot_dimension_numbers<[1], [0], [0], [1], [0, 0, 1, 1], [], []>} : vector<8x32xf32>, vector<32x32xf32>, vector<8x32xf32> -> vector<8x32xf32>
    %c8_40 = arith.constant 8 : index
    %c0_41 = arith.constant 0 : index
    %85 = vector.load %arg27[%c8_40, %c0_41] : memref<16x32xf32, #tpu.memory_space<vmem>>, vector<8x32xf32>
    tpu.vector_store %arg27[%c8_40, %c0_41], %84 {strides = array<i32>} : memref<16x32xf32, #tpu.memory_space<vmem>>, vector<8x32xf32>,
    %c0_42 = arith.constant 0 : index
    %c0_43 = arith.constant 0 : index
    %86 = vector.load %arg27[%c0_42, %c0_43] : memref<16x32xf32, #tpu.memory_space<vmem>>, vector<16x32xf32>
    %cst_44 = arith.constant dense<0.000000e+00> : vector<16x32xf32>
    %87 = tpu.matmul %86, %38, %cst_44 {dimension_numbers = #tpu.dot_dimension_numbers<[1], [0], [0], [1], [0, 0, 1, 1], [], []>} : vector<16x32xf32>, vector<32x32xf32>, vector<16x32xf32> -> vector<16x32xf32>
    %88 = vector.broadcast %39 : vector<1x32xf32> to vector<16x32xf32>
    %89 = arith.addf %87, %88 : vector<16x32xf32>
    %90 = arith.addf %0, %89 : vector<16x32xf32>
    %c1 = arith.constant 1 : index
    %c0_45 = arith.constant 0 : index
    %91 = vector.load %arg22[%c1, %c0_45] : memref<3x32xf32, #tpu.memory_space<vmem>>, vector<1x32xf32>
    %c1_46 = arith.constant 1 : index
    %c0_47 = arith.constant 0 : index
    %92 = vector.load %arg23[%c1_46, %c0_47] : memref<3x32xf32, #tpu.memory_space<vmem>>, vector<1x32xf32>
    %cst_48 = arith.constant dense<0.000000e+00> : vector<16xf32>
    %93 = vector.multi_reduction <add>, %90, %cst_48 [1] : vector<16x32xf32> to vector<16xf32>
    %94 = vector.shape_cast %93 : vector<16xf32> to vector<16x1xf32>
    %cst_49 = arith.constant 3.200000e+01 : f32
    %95 = vector.broadcast %cst_49 : f32 to vector<16x1xf32>
    %96 = arith.divf %94, %95 : vector<16x1xf32>
    %97 = vector.broadcast %96 : vector<16x1xf32> to vector<16x32xf32>
    %98 = arith.subf %90, %97 : vector<16x32xf32>
    %99 = arith.mulf %98, %98 : vector<16x32xf32>
    %cst_50 = arith.constant dense<0.000000e+00> : vector<16xf32>
    %100 = vector.multi_reduction <add>, %99, %cst_50 [1] : vector<16x32xf32> to vector<16xf32>
    %101 = vector.shape_cast %100 : vector<16xf32> to vector<16x1xf32>
    %cst_51 = arith.constant 0.0322580636 : f32
    %102 = vector.broadcast %cst_51 : f32 to vector<16x1xf32>
    %103 = arith.mulf %101, %102 : vector<16x1xf32>
    %104 = math.sqrt %103 : vector<16x1xf32>
    %cst_52 = arith.constant 9.99999997E-7 : f32
    %105 = vector.broadcast %cst_52 : f32 to vector<16x1xf32>
    %106 = arith.addf %104, %105 : vector<16x1xf32>
    %107 = tpu.reciprocal %106 : vector<16x1xf32> -> vector<16x1xf32>
    %108 = vector.broadcast %91 : vector<1x32xf32> to vector<16x32xf32>
    %109 = arith.mulf %108, %98 : vector<16x32xf32>
    %110 = vector.broadcast %107 : vector<16x1xf32> to vector<16x32xf32>
    %111 = arith.mulf %109, %110 : vector<16x32xf32>
    %112 = vector.broadcast %92 : vector<1x32xf32> to vector<16x32xf32>
    %113 = arith.addf %111, %112 : vector<16x32xf32>
    %c0_53 = arith.constant 0 : index
    %c0_54 = arith.constant 0 : index
    %114 = vector.load %arg12[%c0_53, %c0_54] : memref<32x32xf32, #tpu.memory_space<vmem>>, vector<32x32xf32>
    %cst_55 = arith.constant dense<0.000000e+00> : vector<16x32xf32>
    %115 = tpu.matmul %113, %114, %cst_55 {dimension_numbers = #tpu.dot_dimension_numbers<[1], [0], [0], [1], [0, 0, 1, 1], [], []>} : vector<16x32xf32>, vector<32x32xf32>, vector<16x32xf32> -> vector<16x32xf32>
    %c0_56 = arith.constant 0 : index
    %c0_57 = arith.constant 0 : index
    %116 = vector.load %arg13[%c0_56, %c0_57] : memref<1x32xf32, #tpu.memory_space<vmem>>, vector<1x32xf32>
    %117 = vector.broadcast %116 : vector<1x32xf32> to vector<16x32xf32>
    %118 = arith.addf %115, %117 : vector<16x32xf32>
    %cst_58 = arith.constant 0.353553385 : f32
    %119 = vector.broadcast %cst_58 : f32 to vector<16x32xf32>
    %120 = arith.mulf %118, %119 : vector<16x32xf32>
    %c0_59 = arith.constant 0 : index
    %c0_60 = arith.constant 0 : index
    %121 = vector.load %arg14[%c0_59, %c0_60] : memref<32x64xf32, #tpu.memory_space<vmem>>, vector<32x64xf32>
    %cst_61 = arith.constant dense<0.000000e+00> : vector<16x64xf32>
    %122 = tpu.matmul %1, %121, %cst_61 {dimension_numbers = #tpu.dot_dimension_numbers<[1], [0], [0], [1], [0, 0, 1, 1], [], []>} : vector<16x32xf32>, vector<32x64xf32>, vector<16x64xf32> -> vector<16x64xf32>
    %c0_62 = arith.constant 0 : index
    %c0_63 = arith.constant 0 : index
    %123 = vector.load %arg15[%c0_62, %c0_63] : memref<1x64xf32, #tpu.memory_space<vmem>>, vector<1x64xf32>
    %124 = vector.broadcast %123 : vector<1x64xf32> to vector<16x64xf32>
    %125 = arith.addf %122, %124 : vector<16x64xf32>
    %126 = vector.extract_strided_slice %125 {offsets = [0, 0], sizes = [16, 32], strides = [1, 1]} : vector<16x64xf32> to vector<16x32xf32>
    %127 = vector.extract_strided_slice %125 {offsets = [0, 32], sizes = [16, 32], strides = [1, 1]} : vector<16x64xf32> to vector<16x32xf32>
    %c0_64 = arith.constant 0 : index
    %c0_65 = arith.constant 0 : index
    %128 = vector.load %arg3[%c0_64, %c0_65] : memref<16x32xf32, #tpu.memory_space<vmem>>, vector<16x32xf32>
    %c0_66 = arith.constant 0 : index
    %c0_67 = arith.constant 0 : index
    %129 = vector.load %arg6[%c0_66, %c0_67] : memref<32x32xf32, #tpu.memory_space<vmem>>, vector<32x32xf32>
    %c0_68 = arith.constant 0 : index
    %c0_69 = arith.constant 0 : index
    %130 = vector.load %arg7[%c0_68, %c0_69] : memref<32x32xf32, #tpu.memory_space<vmem>>, vector<32x32xf32>
    %c0_70 = arith.constant 0 : index
    %c0_71 = arith.constant 0 : index
    %131 = vector.load %arg16[%c0_70, %c0_71] : memref<32x32xf32, #tpu.memory_space<vmem>>, vector<32x32xf32>
    %c0_72 = arith.constant 0 : index
    %c0_73 = arith.constant 0 : index
    %132 = vector.load %arg17[%c0_72, %c0_73] : memref<1x32xf32, #tpu.memory_space<vmem>>, vector<1x32xf32>
    %133 = vector.extract_strided_slice %126 {offsets = [0, 0], sizes = [8, 32], strides = [1, 1]} : vector<16x32xf32> to vector<8x32xf32>
    %134 = vector.extract_strided_slice %127 {offsets = [0, 0], sizes = [8, 32], strides = [1, 1]} : vector<16x32xf32> to vector<8x32xf32>
    %135 = vector.shape_cast %133 : vector<8x32xf32> to vector<1x8x32xf32>
    %136 = vector.shape_cast %135 : vector<1x8x32xf32> to vector<1x8x32xf32>
    %137 = vector.broadcast %136 : vector<1x8x32xf32> to vector<4x8x32xf32>
    %138 = vector.shape_cast %137 : vector<4x8x32xf32> to vector<32x32xf32>
    %139 = arith.mulf %138, %129 : vector<32x32xf32>
    %140 = vector.shape_cast %134 : vector<8x32xf32> to vector<1x8x32xf32>
    %141 = vector.shape_cast %140 : vector<1x8x32xf32> to vector<1x8x32xf32>
    %142 = vector.broadcast %141 : vector<1x8x32xf32> to vector<4x8x32xf32>
    %143 = vector.shape_cast %142 : vector<4x8x32xf32> to vector<32x32xf32>
    %144 = arith.mulf %143, %129 : vector<32x32xf32>
    %145 = vector.extract_strided_slice %120 {offsets = [0, 0], sizes = [8, 32], strides = [1, 1]} : vector<16x32xf32> to vector<8x32xf32>
    %cst_74 = arith.constant dense<0.000000e+00> : vector<8x32xf32>
    %146 = tpu.matmul %145, %139, %cst_74 {dimension_numbers = #tpu.dot_dimension_numbers<[1], [1], [0], [0], [0, 0, 1, 0], [], []>} : vector<8x32xf32>, vector<32x32xf32>, vector<8x32xf32> -> vector<8x32xf32>
    %c0_75 = arith.constant 0 : index
    %c0_76 = arith.constant 0 : index
    %147 = vector.load %arg26[%c0_75, %c0_76] : memref<16x32xf32, #tpu.memory_space<vmem>>, vector<8x32xf32>
    tpu.vector_store %arg26[%c0_75, %c0_76], %146 {strides = array<i32>} : memref<16x32xf32, #tpu.memory_space<vmem>>, vector<8x32xf32>,
    %148 = vector.extract_strided_slice %126 {offsets = [8, 0], sizes = [8, 32], strides = [1, 1]} : vector<16x32xf32> to vector<8x32xf32>
    %149 = vector.extract_strided_slice %127 {offsets = [8, 0], sizes = [8, 32], strides = [1, 1]} : vector<16x32xf32> to vector<8x32xf32>
    %150 = vector.shape_cast %148 : vector<8x32xf32> to vector<1x8x32xf32>
    %151 = vector.shape_cast %150 : vector<1x8x32xf32> to vector<1x8x32xf32>
    %152 = vector.broadcast %151 : vector<1x8x32xf32> to vector<4x8x32xf32>
    %153 = vector.shape_cast %152 : vector<4x8x32xf32> to vector<32x32xf32>
    %154 = arith.mulf %153, %129 : vector<32x32xf32>
    %155 = vector.shape_cast %149 : vector<8x32xf32> to vector<1x8x32xf32>
    %156 = vector.shape_cast %155 : vector<1x8x32xf32> to vector<1x8x32xf32>
    %157 = vector.broadcast %156 : vector<1x8x32xf32> to vector<4x8x32xf32>
    %158 = vector.shape_cast %157 : vector<4x8x32xf32> to vector<32x32xf32>
    %159 = arith.mulf %158, %129 : vector<32x32xf32>
    %160 = vector.extract_strided_slice %120 {offsets = [8, 0], sizes = [8, 32], strides = [1, 1]} : vector<16x32xf32> to vector<8x32xf32>
    %cst_77 = arith.constant dense<0.000000e+00> : vector<8x32xf32>
    %161 = tpu.matmul %160, %154, %cst_77 {dimension_numbers = #tpu.dot_dimension_numbers<[1], [1], [0], [0], [0, 0, 1, 0], [], []>} : vector<8x32xf32>, vector<32x32xf32>, vector<8x32xf32> -> vector<8x32xf32>
    %c8_78 = arith.constant 8 : index
    %c0_79 = arith.constant 0 : index
    %162 = vector.load %arg26[%c8_78, %c0_79] : memref<16x32xf32, #tpu.memory_space<vmem>>, vector<8x32xf32>
    tpu.vector_store %arg26[%c8_78, %c0_79], %161 {strides = array<i32>} : memref<16x32xf32, #tpu.memory_space<vmem>>, vector<8x32xf32>,
    %c0_80 = arith.constant 0 : index
    %c0_81 = arith.constant 0 : index
    %163 = vector.load %arg26[%c0_80, %c0_81] : memref<16x32xf32, #tpu.memory_space<vmem>>, vector<16x32xf32>
    %164 = arith.addf %163, %128 : vector<16x32xf32>
    %cst_82 = arith.constant dense<0xFF800000> : vector<16xf32>
    %165 = vector.multi_reduction <maximumf>, %164, %cst_82 [1] : vector<16x32xf32> to vector<16xf32>
    %166 = vector.shape_cast %165 : vector<16xf32> to vector<16x1xf32>
    %167 = vector.broadcast %166 : vector<16x1xf32> to vector<16x32xf32>
    %168 = arith.subf %164, %167 : vector<16x32xf32>
    %169 = math.exp %168 : vector<16x32xf32>
    %cst_83 = arith.constant dense<0.000000e+00> : vector<16x32xf32>
    %170 = tpu.matmul %169, %130, %cst_83 {dimension_numbers = #tpu.dot_dimension_numbers<[1], [0], [0], [1], [0, 0, 1, 1], [], []>} : vector<16x32xf32>, vector<32x32xf32>, vector<16x32xf32> -> vector<16x32xf32>
    %171 = tpu.reciprocal %170 : vector<16x32xf32> -> vector<16x32xf32>
    %172 = arith.mulf %169, %171 : vector<16x32xf32>
    %173 = vector.extract_strided_slice %172 {offsets = [0, 0], sizes = [8, 32], strides = [1, 1]} : vector<16x32xf32> to vector<8x32xf32>
    %cst_84 = arith.constant dense<0.000000e+00> : vector<8x32xf32>
    %174 = tpu.matmul %173, %144, %cst_84 {dimension_numbers = #tpu.dot_dimension_numbers<[1], [0], [0], [1], [0, 0, 1, 1], [], []>} : vector<8x32xf32>, vector<32x32xf32>, vector<8x32xf32> -> vector<8x32xf32>
    %c0_85 = arith.constant 0 : index
    %c0_86 = arith.constant 0 : index
    %175 = vector.load %arg27[%c0_85, %c0_86] : memref<16x32xf32, #tpu.memory_space<vmem>>, vector<8x32xf32>
    tpu.vector_store %arg27[%c0_85, %c0_86], %174 {strides = array<i32>} : memref<16x32xf32, #tpu.memory_space<vmem>>, vector<8x32xf32>,
    %176 = vector.extract_strided_slice %172 {offsets = [8, 0], sizes = [8, 32], strides = [1, 1]} : vector<16x32xf32> to vector<8x32xf32>
    %cst_87 = arith.constant dense<0.000000e+00> : vector<8x32xf32>
    %177 = tpu.matmul %176, %159, %cst_87 {dimension_numbers = #tpu.dot_dimension_numbers<[1], [0], [0], [1], [0, 0, 1, 1], [], []>} : vector<8x32xf32>, vector<32x32xf32>, vector<8x32xf32> -> vector<8x32xf32>
    %c8_88 = arith.constant 8 : index
    %c0_89 = arith.constant 0 : index
    %178 = vector.load %arg27[%c8_88, %c0_89] : memref<16x32xf32, #tpu.memory_space<vmem>>, vector<8x32xf32>
    tpu.vector_store %arg27[%c8_88, %c0_89], %177 {strides = array<i32>} : memref<16x32xf32, #tpu.memory_space<vmem>>, vector<8x32xf32>,
    %c0_90 = arith.constant 0 : index
    %c0_91 = arith.constant 0 : index
    %179 = vector.load %arg27[%c0_90, %c0_91] : memref<16x32xf32, #tpu.memory_space<vmem>>, vector<16x32xf32>
    %cst_92 = arith.constant dense<0.000000e+00> : vector<16x32xf32>
    %180 = tpu.matmul %179, %131, %cst_92 {dimension_numbers = #tpu.dot_dimension_numbers<[1], [0], [0], [1], [0, 0, 1, 1], [], []>} : vector<16x32xf32>, vector<32x32xf32>, vector<16x32xf32> -> vector<16x32xf32>
    %181 = vector.broadcast %132 : vector<1x32xf32> to vector<16x32xf32>
    %182 = arith.addf %180, %181 : vector<16x32xf32>
    %183 = arith.addf %90, %182 : vector<16x32xf32>
    %c2 = arith.constant 2 : index
    %c0_93 = arith.constant 0 : index
    %184 = vector.load %arg22[%c2, %c0_93] : memref<3x32xf32, #tpu.memory_space<vmem>>, vector<1x32xf32>
    %c2_94 = arith.constant 2 : index
    %c0_95 = arith.constant 0 : index
    %185 = vector.load %arg23[%c2_94, %c0_95] : memref<3x32xf32, #tpu.memory_space<vmem>>, vector<1x32xf32>
    %cst_96 = arith.constant dense<0.000000e+00> : vector<16xf32>
    %186 = vector.multi_reduction <add>, %183, %cst_96 [1] : vector<16x32xf32> to vector<16xf32>
    %187 = vector.shape_cast %186 : vector<16xf32> to vector<16x1xf32>
    %cst_97 = arith.constant 3.200000e+01 : f32
    %188 = vector.broadcast %cst_97 : f32 to vector<16x1xf32>
    %189 = arith.divf %187, %188 : vector<16x1xf32>
    %190 = vector.broadcast %189 : vector<16x1xf32> to vector<16x32xf32>
    %191 = arith.subf %183, %190 : vector<16x32xf32>
    %192 = arith.mulf %191, %191 : vector<16x32xf32>
    %cst_98 = arith.constant dense<0.000000e+00> : vector<16xf32>
    %193 = vector.multi_reduction <add>, %192, %cst_98 [1] : vector<16x32xf32> to vector<16xf32>
    %194 = vector.shape_cast %193 : vector<16xf32> to vector<16x1xf32>
    %cst_99 = arith.constant 0.0322580636 : f32
    %195 = vector.broadcast %cst_99 : f32 to vector<16x1xf32>
    %196 = arith.mulf %194, %195 : vector<16x1xf32>
    %197 = math.sqrt %196 : vector<16x1xf32>
    %cst_100 = arith.constant 9.99999997E-7 : f32
    %198 = vector.broadcast %cst_100 : f32 to vector<16x1xf32>
    %199 = arith.addf %197, %198 : vector<16x1xf32>
    %200 = tpu.reciprocal %199 : vector<16x1xf32> -> vector<16x1xf32>
    %201 = vector.broadcast %184 : vector<1x32xf32> to vector<16x32xf32>
    %202 = arith.mulf %201, %191 : vector<16x32xf32>
    %203 = vector.broadcast %200 : vector<16x1xf32> to vector<16x32xf32>
    %204 = arith.mulf %202, %203 : vector<16x32xf32>
    %205 = vector.broadcast %185 : vector<1x32xf32> to vector<16x32xf32>
    %206 = arith.addf %204, %205 : vector<16x32xf32>
    %c0_101 = arith.constant 0 : index
    %c0_102 = arith.constant 0 : index
    %207 = vector.load %arg18[%c0_101, %c0_102] : memref<32x64xf32, #tpu.memory_space<vmem>>, vector<32x64xf32>
    %cst_103 = arith.constant dense<0.000000e+00> : vector<16x64xf32>
    %208 = tpu.matmul %206, %207, %cst_103 {dimension_numbers = #tpu.dot_dimension_numbers<[1], [0], [0], [1], [0, 0, 1, 1], [], []>} : vector<16x32xf32>, vector<32x64xf32>, vector<16x64xf32> -> vector<16x64xf32>
    %c0_104 = arith.constant 0 : index
    %c0_105 = arith.constant 0 : index
    %209 = vector.load %arg19[%c0_104, %c0_105] : memref<1x64xf32, #tpu.memory_space<vmem>>, vector<1x64xf32>
    %210 = vector.broadcast %209 : vector<1x64xf32> to vector<16x64xf32>
    %211 = arith.addf %208, %210 : vector<16x64xf32>
    %cst_106 = arith.constant 0.000000e+00 : f32
    %212 = vector.broadcast %cst_106 : f32 to vector<16x64xf32>
    %213 = arith.maximumf %211, %212 : vector<16x64xf32>
    %c0_107 = arith.constant 0 : index
    %c0_108 = arith.constant 0 : index
    %214 = vector.load %arg20[%c0_107, %c0_108] : memref<64x32xf32, #tpu.memory_space<vmem>>, vector<64x32xf32>
    %cst_109 = arith.constant dense<0.000000e+00> : vector<16x32xf32>
    %215 = tpu.matmul %213, %214, %cst_109 {dimension_numbers = #tpu.dot_dimension_numbers<[1], [0], [0], [1], [0, 0, 1, 1], [], []>} : vector<16x64xf32>, vector<64x32xf32>, vector<16x32xf32> -> vector<16x32xf32>
    %216 = arith.addf %183, %215 : vector<16x32xf32>
    %c0_110 = arith.constant 0 : index
    %c0_111 = arith.constant 0 : index
    %217 = vector.load %arg21[%c0_110, %c0_111] : memref<1x32xf32, #tpu.memory_space<vmem>>, vector<1x32xf32>
    %218 = vector.broadcast %217 : vector<1x32xf32> to vector<16x32xf32>
    %219 = arith.addf %216, %218 : vector<16x32xf32>
    %c0_112 = arith.constant 0 : index
    %c0_113 = arith.constant 0 : index
    %220 = vector.load %arg24[%c0_112, %c0_113] : memref<16x32xf32, #tpu.memory_space<vmem>>, vector<16x32xf32>
    tpu.vector_store %arg24[%c0_112, %c0_113], %219 {strides = array<i32>} : memref<16x32xf32, #tpu.memory_space<vmem>>, vector<16x32xf32>,
    return
  }
}

</mosaic_0001>

<bundles_post_ra>
// kernel: tpu_custom_call.1
= control target key start
LH: loop header
LB: loop body
LE: loop exit
PB: predicated region body
PF: predicated region fallthrough
CT: control target
= control target key end

     0   :  { %s2428_s0 = inlined_call_operand.hbm [shape: f32[16,32], index: 0, kind: input, shape index: {}]   ;;  %s2429_s1 = inlined_call_operand.hbm [shape: f32[16,32], index: 1, kind: input, shape index: {}]   ;;  %s2430_s2 = inlined_call_operand.hbm [shape: f32[16,32], index: 2, kind: input, shape index: {}]   ;;  %s2431_s3 = inlined_call_operand.hbm [shape: f32[16,32], index: 3, kind: input, shape index: {}]   ;;  %s2432_s4 = inlined_call_operand.vmem [shape: f32[32,32], index: 4, kind: input, shape index: {}]   ;;  %s2433_s5 = inlined_call_operand.vmem [shape: f32[32,32], index: 5, kind: input, shape index: {}]   ;;  %s2434_s6 = inlined_call_operand.vmem [shape: f32[32,32], index: 6, kind: input, shape index: {}]   ;;  %s2435_s7 = inlined_call_operand.hbm [shape: f32[32,32], index: 7, kind: input, shape index: {}]   ;;  %s2436_s8 = inlined_call_operand.hbm [shape: f32[32,96], index: 8, kind: input, shape index: {}]   ;;  %s2437_s9 = inlined_call_operand.vmem [shape: f32[1,96], index: 9, kind: input, shape index: {}]   ;;  %s2438_s10 = inlined_call_operand.hbm [shape: f32[32,32], index: 10, kind: input, shape index: {}]   ;;  %s2439_s11 = inlined_call_operand.hbm [shape: f32[1,32], index: 11, kind: input, shape index: {}]   ;;  %s2440_s12 = inlined_call_operand.hbm [shape: f32[32,32], index: 12, kind: input, shape index: {}]   ;;  %s2441_s13 = inlined_call_operand.vmem [shape: f32[1,32], index: 13, kind: input, shape index: {}]   ;;  %s2442_s14 = inlined_call_operand.hbm [shape: f32[32,64], index: 14, kind: input, shape index: {}]   ;;  %s2443_s15 = inlined_call_operand.vmem [shape: f32[1,64], index: 15, kind: input, shape index: {}]   ;;  %s2444_s16 = inlined_call_operand.hbm [shape: f32[32,32], index: 16, kind: input, shape index: {}]   ;;  %s2445_s17 = inlined_call_operand.vmem [shape: f32[1,32], index: 17, kind: input, shape index: {}]   ;;  %s2446_s18 = inlined_call_operand.hbm [shape: f32[32,64], index: 18, kind: input, shape index: {}]   ;;  %s2447_s19 = inlined_call_operand.vmem [shape: f32[1,64], index: 19, kind: input, shape index: {}]   ;;  %s2448_s20 = inlined_call_operand.vmem [shape: f32[64,32], index: 20, kind: input, shape index: {}]   ;;  %s2449_s21 = inlined_call_operand.vmem [shape: f32[1,32], index: 21, kind: input, shape index: {}]   ;;  %s2450_s22 = inlined_call_operand.vmem [shape: f32[3,32], index: 22, kind: input, shape index: {}]   ;;  %s2451_s23 = inlined_call_operand.vmem [shape: f32[3,32], index: 23, kind: input, shape index: {}]   ;;  %s2452_s24 = inlined_call_operand.hbm [shape: f32[16,32], index: 24, kind: output, shape index: {}]  }
   0x1   :  { %2456 = sst [smem:[#allocation34_spill]] %s2428_s0 }
   0x2   :  { %2457 = sst [smem:[#allocation35_spill]] %s2429_s1 }
   0x3   :  { %2458 = sst [smem:[#allocation36_spill]] %s2430_s2 }
   0x4   :  { %2459 = sst [smem:[#allocation37_spill]] %s2431_s3 }
   0x5   :  { %2460 = sst [smem:[#allocation38_spill]] %s2432_s4 }
   0x6   :  { %2461 = sst [smem:[#allocation39_spill]] %s2433_s5 }
   0x7   :  { %2462 = sst [smem:[#allocation40_spill]] %s2434_s6 }
   0x8   :  { %2463 = sst [smem:[#allocation41_spill]] %s2435_s7 }
   0x9   :  { %2464 = sst [smem:[#allocation42_spill]] %s2436_s8 }
   0xa   :  { %2465 = sst [smem:[#allocation43_spill]] %s2452_s24 }
   0xb   :  { %29 = vsyncpa [#allocation6], 0 }
   0xc   :  { %30 = vsyncpa [#allocation9], 0 }
   0xd   :  { %31 = vsyncpa [#allocation12], 0 }
   0xe   :  { %32 = vsyncpa [#allocation15], 0 }
   0xf   :  { %33 = vsyncpa [#allocation18], 0 }
  0x10   :  { %34 = vsyncpa [#allocation21], 0 }
  0x11   :  { %35 = vsyncpa [#allocation24], 0 }
  0x12   :  { %36 = vsyncpa [#allocation7], 0  ;;  %s2466_s27 = sld [smem:[#allocation35_spill]]  ;;  %s1890_s6 = smov [#allocation8]  }
  0x13   :  { %s56_s2 = sshll.u32 %s1890_s6, 4  ;;  %s2467_s7 = sld [smem:[#allocation37_spill]]  ;;  %s57_s2 = int_to_ptr.vmem [resolvable:$true] %s56_s2 }
  0x14   :  { %s1891_s3 = smov 128   ;;  %s1892_s25 = smov 8  }
  0x15   :  { %s1893_s8 = smov [#allocation11]   ;;  %s2468_s26 = sld [smem:[#allocation42_spill]] }
  0x16   :  { %s82_s4 = sshll.u32 %s1893_s8, 4  ;;  %s141_s0 = sshll.u32 %s2439_s11, 4  ;;  %s83_s4 = int_to_ptr.vmem [resolvable:$true] %s82_s4  ;;  %s142_s0 = int_to_ptr.hbm [resolvable:$true] %s141_s0 }
  0x17   :  { %s166_s5 = sshll.u32 %s2442_s14, 4  ;;  %s2469_s11 = sld [smem:[#allocation34_spill]]  ;;  %s167_s5 = int_to_ptr.hbm [resolvable:$true] %s166_s5 }
  0x18   :  { %s54_s28 = sshll.u32 %s2466_s27, 4  ;;  %s1896_s6 = smov [#allocation20]   ;;  %s55_s28 = int_to_ptr.hbm [resolvable:$true] %s54_s28 }
  0x19   :  { %s80_s30 = sshll.u32 %s2467_s7, 4  ;;  %s1894_s7 = smov [#allocation14]   ;;  %s81_s30 = int_to_ptr.hbm [resolvable:$true] %s80_s30 }
  0x1a   :  { %62 = dma.hbm_to_vmem [thread:$0]  %s55_s28, 256, %s57_s2, [#allocation9], %s1891_s3, %s1891_s3, %s1892_s25  }
  0x1b   :  { %s112_s27 = sshll.u32 %s2468_s26, 4  ;;  %s114_s24 = sshll.u32 %s1894_s7, 4  ;;  %s113_s27 = int_to_ptr.hbm [resolvable:$true] %s112_s27  ;;  %s115_s24 = int_to_ptr.vmem [resolvable:$true] %s114_s24 }
  0x1c   :  { %88 = dma.hbm_to_vmem [thread:$0]  %s81_s30, 256, %s83_s4, [#allocation12], %s1891_s3, %s1891_s3, %s1892_s25  }
  0x1d   :  { %120 = dma.hbm_to_vmem [thread:$0]  %s113_s27, 512, %s115_s24, [#allocation15], %s1891_s3, %s1891_s3, %s1892_s25  }
  0x1e   :  { %s1895_s28 = smov [#allocation17]   ;;  %s41_s26 = sshll.u32 %s2469_s11, 4  ;;  %s42_s26 = int_to_ptr.hbm [resolvable:$true] %s41_s26 }
  0x1f   :  { %s143_s2 = sshll.u32 %s1895_s28, 4  ;;  %s168_s29 = sshll.u32 %s1896_s6, 4  ;;  %s144_s2 = int_to_ptr.vmem [resolvable:$true] %s143_s2  ;;  %s169_s29 = int_to_ptr.vmem [resolvable:$true] %s168_s29 }
  0x20   :  { %146 = dma.hbm_to_vmem [thread:$0]  %s142_s0, 16, %s144_s2, [#allocation18]  }
  0x21   :  { %174 = dma.hbm_to_vmem [thread:$0]  %s167_s5, 512, %s169_s29, [#allocation21], %s1891_s3, %s1891_s3, %s1892_s25  }
  0x22   :  { %s1897_s24 = smov [#allocation5]   ;;  %s2470_s14 = sld [smem:[#allocation36_spill]] }
  0x23   :  { %s43_s27 = sshll.u32 %s1897_s24, 4  ;;  %s2471_s1 = sld [smem:[#allocation41_spill]]  ;;  %s44_s27 = int_to_ptr.vmem [resolvable:$true] %s43_s27 }
  0x24   :  { %49 = dma.hbm_to_vmem [thread:$0]  %s42_s26, 256, %s44_s27, [#allocation6], %s1891_s3, %s1891_s3, %s1892_s25  }
  0x25   :  { %s1898_s4 = smov [#allocation10]   ;;  %s1899_s5 = smov [#allocation13]  }
  0x26   :  { %s69_s11 = sshll.u32 %s1898_s4, 4  ;;  %s101_s6 = sshll.u32 %s1899_s5, 4  ;;  %s70_s11 = int_to_ptr.vmem [resolvable:$true] %s69_s11  ;;  %s102_s6 = int_to_ptr.vmem [resolvable:$true] %s101_s6 }
  0x27   :  { %s127_s7 = sshll.u32 %s2438_s10, 4  ;;  %s151_s28 = sshll.u32 %s2440_s12, 4  ;;  %s128_s7 = int_to_ptr.hbm [resolvable:$true] %s127_s7  ;;  %s152_s28 = int_to_ptr.hbm [resolvable:$true] %s151_s28 }
  0x28   :  { %s67_s8 = sshll.u32 %s2470_s14, 4  ;;  %s1900_s14 = smov [#allocation16]   ;;  %s68_s8 = int_to_ptr.hbm [resolvable:$true] %s67_s8 }
  0x29   :  { %s99_s30 = sshll.u32 %s2471_s1, 4  ;;  %s129_s0 = sshll.u32 %s1900_s14, 4  ;;  %s100_s30 = int_to_ptr.hbm [resolvable:$true] %s99_s30  ;;  %s130_s0 = int_to_ptr.vmem [resolvable:$true] %s129_s0 }
  0x2a   :  { %75 = dma.hbm_to_vmem [thread:$0]  %s68_s8, 256, %s70_s11, [#allocation9], %s1891_s3, %s1891_s3, %s1892_s25  }
  0x2b   :  { %107 = dma.hbm_to_vmem [thread:$0]  %s100_s30, 512, %s102_s6, [#allocation12], %s1891_s3, %s1891_s3, %s1892_s25  }
  0x2c   :  { %135 = dma.hbm_to_vmem [thread:$0]  %s128_s7, 512, %s130_s0, [#allocation15], %s1891_s3, %s1891_s3, %s1892_s25  }
  0x2d   :  { %s1901_s8 = smov [#allocation19]   ;;  %s181_s4 = sshll.u32 %s2444_s16, 4  ;;  %s182_s4 = int_to_ptr.hbm [resolvable:$true] %s181_s4 }
  0x2e   :  { %s153_s10 = sshll.u32 %s1901_s8, 4  ;;  %s196_s11 = sshll.u32 %s2446_s18, 4  ;;  %s154_s10 = int_to_ptr.vmem [resolvable:$true] %s153_s10  ;;  %s197_s11 = int_to_ptr.hbm [resolvable:$true] %s196_s11 }
  0x2f   :  { %159 = dma.hbm_to_vmem [thread:$0]  %s152_s28, 512, %s154_s10, [#allocation18], %s1891_s3, %s1891_s3, %s1892_s25  }
  0x30   :  { %s1902_s5 = smov [#allocation22]   ;;  %s1903_s29 = smov [#allocation23]  }
  0x31   :  { %s183_s6 = sshll.u32 %s1902_s5, 4  ;;  %s198_s16 = sshll.u32 %s1903_s29, 4  ;;  %s184_s6 = int_to_ptr.vmem [resolvable:$true] %s183_s6  ;;  %s199_s16 = int_to_ptr.vmem [resolvable:$true] %s198_s16 }
  0x32   :  { %189 = dma.hbm_to_vmem [thread:$0]  %s182_s4, 512, %s184_s6, [#allocation21], %s1891_s3, %s1891_s3, %s1892_s25  }
  0x33   :  { %204 = dma.hbm_to_vmem [thread:$0]  %s197_s11, 512, %s199_s16, [#allocation24], %s1891_s3, %s1891_s3, %s1892_s25  }
  0x34   :  { %1874 = dma.done.wait [#allocation6], 256  }
  0x35   :  { %1875 = vsyncadd [#allocation6], 4294967040 }
  0x36   :  { %1876 = dma.done.wait [#allocation9], 512  }
  0x37   :  { %1877 = vsyncadd [#allocation9], 4294966784 }
  0x38   :  { %1878 = dma.done.wait [#allocation12], 768  }
  0x39   :  { %1879 = vsyncadd [#allocation12], 4294966528 }
  0x3a   :  { %1880 = dma.done.wait [#allocation15], 1024  }
  0x3b   :  { %1881 = vsyncadd [#allocation15], 4294966272 }
  0x3c   :  { %1882 = dma.done.wait [#allocation18], 528  }
  0x3d   :  { %1883 = vsyncadd [#allocation18], 4294966768 }
  0x3e   :  { %1884 = dma.done.wait [#allocation21], 1024  }
  0x3f   :  { %1885 = vsyncadd [#allocation21], 4294966272 }
  0x40   :  { %1886 = dma.done.wait [#allocation24], 512  }
  0x41   :  { %1887 = vsyncadd [#allocation24], 4294966784  ;;  %vm269_vm0 = vcmask 261120   ;;  %v2103_v0 = vld [vmem:[#allocation5] sm:$0xff]  ;;  %v2107_v2 = vld [vmem:[#allocation5 + $0x8] sm:$0xff]  ;;  %v1904_v4 = vmov 32.0  }
  0x42   :  { %v270_v1 = vsel %vm269_vm0, %v2103_v0, 0.0  ;;  %v273_v3 = vsel %vm269_vm0, %v2107_v2, 0.0  ;;  %1520 = vrcp.f32 %v1904_v4  ;;  %v362_v21 = vld [vmem:[#allocation14 + $0x18] sm:$0xff]  ;;  %v361_v22 = vld [vmem:[#allocation14 + $0x10] sm:$0xff]  ;;  %v360_v23 = vld [vmem:[#allocation14 + $0x8] sm:$0xff]  ;;  %s2472_s7 = sld [smem:[#allocation38_spill]] }
  0x43   :  { %271 = vadd.xlane.f32.xlu0 %v270_v1  ;;  %385 = vmatpush.msra.mxu1 %v362_v21  ;;  %v359_v25 = vld [vmem:[#allocation14] sm:$0xff]  ;;  %s1905_s0 = smov 32   ;;  %v1507_v59 = vld [vmem:[%s2450_s22] ss:$0 sm:$0xff]  ;;  %s1906_s5 = smov 96  }
  0x44   :  { %s2473_s16 = sld [smem:[#allocation39_spill]] }
  0x45   :  { %386 = vmatpush.msra.mxu1 %v361_v22  ;;  %s2474_s10 = sld [smem:[#allocation40_spill]] }
  0x47   :  { %387 = vmatpush.msra.mxu1 %v360_v23 }
  0x48   :  { %v1521_v5 = vpop.eup %1520  ;;  %v2130_v43 = vld [vmem:[%s2472_s7 + $0x8] sm:$0xff]  ;;  %v2135_v44 = vld [vmem:[%s2472_s7] sm:$0xff]  ;;  %v2140_v45 = vld [vmem:[%s2472_s7 + $0x18] sm:$0xff] }
  0x49   :  { %v277_v6 = vmul.f32 32.0, %v1521_v5  ;;  %vm281_vm1 = vweird.f32 %v1521_v5  ;;  %388 = vmatpush.msra.mxu1 %v359_v25  ;;  %423 = vrot.lane.b32.xlu2 %v2140_v45, %s1905_s0  ;;  %v2151_v52 = vld [vmem:[%s2472_s7 + $0x10] sm:$0xff] }
  0x4b   :  { %274 = vadd.xlane.f32.xlu0 %v273_v3  ;;  %v278_v7 = vsub.f32 1.0, %v277_v6 }
  0x4d   :  { %v279_v8 = vmul.f32 %v1521_v5, %v278_v7 }
  0x4f   :  { %v280_v9 = vadd.f32 %v1521_v5, %v279_v8 }
  0x51   :  { %v2111_v10 = vsel %vm281_vm1, %v1521_v5, %v280_v9  ;;  %421 = vrot.lane.b32.xlu2 %v2151_v52, %s1905_s0  ;;  %v1508_v5 = vld [vmem:[%s2451_s23] ss:$0 sm:$0xff] }
  0x5f   :  { %419 = vrot.lane.b32.xlu0 %v2130_v43, %s1905_s0 }
  0xa3   :  { %v424_v23 = vpop.permute.xlu2 %423 }
  0xab   :  { %v422_v25 = vpop.permute.xlu2 %421 }
  0xb6   :  { %v272_v11 = vpop.xlane.xlu0 %271 }
  0xb7   :  { %v283_v12 = vmul.f32 %v2111_v10, %v272_v11 }
  0xb9   :  { %v2115_v13 = vsub.f32 %v2103_v0, %v283_v12 }
  0xbb   :  { %v287_v14 = vmul.f32 %v2115_v13, %v2115_v13  ;;  %v352_v3 = vmul.f32 %v1507_v59, %v2115_v13 }
  0xbd   :  { %v289_v15 = vsel %vm269_vm0, %v287_v14, 0.0 }
  0xbe   :  { %290 = vadd.xlane.f32.xlu1 %v289_v15  ;;  %v275_v16 = vpop.xlane.xlu0 %274 }
  0xbf   :  { %v284_v17 = vmul.f32 %v2111_v10, %v275_v16 }
  0xc1   :  { %v2122_v18 = vsub.f32 %v2107_v2, %v284_v17 }
  0xc3   :  { %v288_v19 = vmul.f32 %v2122_v18, %v2122_v18  ;;  %v353_v17 = vmul.f32 %v1507_v59, %v2122_v18 }
  0xc5   :  { %v292_v20 = vsel %vm269_vm0, %v288_v19, 0.0 }
  0xc6   :  { %293 = vadd.xlane.f32.xlu1 %v292_v20 }
  0xdf   :  { %417 = vrot.lane.b32.xlu1 %v2135_v44, %s1905_s0 }
 0x131   :  { %v291_v24 = vpop.xlane.xlu1 %290 }
 0x132   :  { %v295_v26 = vmul.f32 0.032258064, %v291_v24  ;;  %v1509_v24 = vld [vmem:[%s2437_s9] ss:$0 sm:$0xff]  ;;  %s1907_s9 = smov 64  }
 0x134   :  { %1522 = vrsqrt.f32 %v295_v26  ;;  %vm304_vm2 = vcmp.eq.f32.partialorder %v295_v26, inf  ;;  %v307_v39 = vand.u32 2147483648, %v295_v26  ;;  %vm306_vm3 = vcmp.eq.f32.partialorder %v295_v26, 0.0 }
 0x139   :  { %v294_v27 = vpop.xlane.xlu1 %293 }
 0x13a   :  { %v1523_v28 = vpop.eup %1522  ;;  %v296_v29 = vmul.f32 0.032258064, %v294_v27  ;;  %v420_v27 = vpop.permute.xlu0 %419 }
 0x13b   :  { %v298_v30 = vmul.f32 %v1523_v28, %v295_v26 }
 0x13c   :  { %1524 = vrsqrt.f32 %v296_v29  ;;  %vm316_vm4 = vcmp.eq.f32.partialorder %v296_v29, inf  ;;  %v319_v50 = vand.u32 2147483648, %v296_v29  ;;  %vm318_vm5 = vcmp.eq.f32.partialorder %v296_v29, 0.0 }
 0x13d   :  { %v299_v31 = vmul.f32 %v1523_v28, %v298_v30 }
 0x13f   :  { %v300_v32 = vmul.f32 0.5, %v299_v31 }
 0x141   :  { %v301_v33 = vsub.f32 1.5, %v300_v32 }
 0x142   :  { %v1525_v34 = vpop.eup %1524 }
 0x143   :  { %v302_v35 = vmul.f32 %v1523_v28, %v301_v33  ;;  %v310_v36 = vmul.f32 %v1525_v34, %v296_v29 }
 0x145   :  { %v303_v37 = vmul.f32 %v302_v35, %v295_v26  ;;  %v311_v38 = vmul.f32 %v1525_v34, %v310_v36 }
 0x147   :  { %v312_v40 = vmul.f32 0.5, %v311_v38  ;;  %v305_v41 = vsel %vm304_vm2, %v295_v26, %v303_v37 }
 0x148   :  { %v308_v42 = vsel %vm306_vm3, %v307_v39, %v305_v41 }
 0x149   :  { %v313_v46 = vsub.f32 1.5, %v312_v40  ;;  %v321_v47 = vadd.f32 1e-06, %v308_v42 }
 0x14b   :  { %v314_v48 = vmul.f32 %v1525_v34, %v313_v46  ;;  %1526 = vrcp.f32 %v321_v47  ;;  %v334_v58 = vand.u32 2147483648, %v321_v47  ;;  %v332_v61 = vand.u32 2147483647, %v321_v47 }
 0x14c   :  { %vm328_vm7 = vweird.f32 %v321_v47 }
 0x14d   :  { %v315_v49 = vmul.f32 %v314_v48, %v296_v29  ;;  %v335_v1 = vor.u32 1.1754944e-38, %v334_v58  ;;  %vm333_vm9 = vcmp.eq.f32.partialorder %v332_v61, 8.507059e+37 }
 0x14f   :  { %v317_v51 = vsel %vm316_vm4, %v296_v29, %v315_v49  ;;  %v407_v49 = vld [vmem:[%s2473_s16 + $0x18] sm:$0xff] }
 0x150   :  { %v320_v53 = vsel %vm318_vm5, %v319_v50, %v317_v51  ;;  %v406_v50 = vld [vmem:[%s2473_s16 + $0x10] sm:$0xff]  ;;  %579 = vmatpush.msra.mxu0 %v407_v49  ;;  %1444 = vmatpush.msra.mxu3 %v407_v49  ;;  %v405_v51 = vld [vmem:[%s2473_s16 + $0x8] sm:$0xff] }
 0x151   :  { %v1527_v54 = vpop.eup %1526  ;;  %v322_v55 = vadd.f32 1e-06, %v320_v53  ;;  %v418_v33 = vpop.permute.xlu1 %417 }
 0x152   :  { %v324_v56 = vmul.f32 %v1527_v54, %v321_v47  ;;  %vm329_vm6 = vweird.f32 %v1527_v54  ;;  %580 = vmatpush.msra.mxu0 %v406_v50  ;;  %1445 = vmatpush.msra.mxu3 %v406_v50 }
 0x153   :  { %1528 = vrcp.f32 %v322_v55  ;;  %vm330_vm8 = vmor %vm328_vm7, %vm329_vm6  ;;  %v348_v11 = vand.u32 2147483648, %v322_v55  ;;  %v346_v15 = vand.u32 2147483647, %v322_v55  ;;  %vm342_vm11 = vweird.f32 %v322_v55 }
 0x154   :  { %v325_v57 = vsub.f32 1.0, %v324_v56  ;;  %581 = vmatpush.msra.mxu0 %v405_v51  ;;  %1446 = vmatpush.msra.mxu3 %v405_v51 }
 0x155   :  { %v349_v13 = vor.u32 1.1754944e-38, %v348_v11  ;;  %vm347_vm13 = vcmp.eq.f32.partialorder %v346_v15, 8.507059e+37  ;;  %v399_v15 = vld [vmem:[#allocation10 + $0x8] sm:$0xff] }
 0x156   :  { %v326_v60 = vmul.f32 %v1527_v54, %v325_v57 }
 0x158   :  { %v327_v62 = vadd.f32 %v1527_v54, %v326_v60 }
 0x159   :  { %v1529_v63 = vpop.eup %1528 }
 0x15a   :  { %v331_v4 = vsel %vm330_vm8, %v1527_v54, %v327_v62  ;;  %v338_v6 = vmul.f32 %v1529_v63, %v322_v55  ;;  %vm343_vm10 = vweird.f32 %v1529_v63 }
 0x15b   :  { %v336_v7 = vsel %vm333_vm9, %v335_v1, %v331_v4  ;;  %vm344_vm12 = vmor %vm342_vm11, %vm343_vm10 }
 0x15c   :  { %v354_v8 = vmul.f32 %v352_v3, %v336_v7  ;;  %v339_v9 = vsub.f32 1.0, %v338_v6  ;;  %v404_v3 = vld [vmem:[%s2473_s16] sm:$0xff] }
 0x15d   :  { %582 = vmatpush.msra.mxu0 %v404_v3  ;;  %1447 = vmatpush.msra.mxu3 %v404_v3  ;;  %v408_v3 = vld [vmem:[#allocation16] sm:$0xff] }
 0x15e   :  { %v357_v12 = vadd.f32 %v1508_v5, %v354_v8  ;;  %v340_v14 = vmul.f32 %v1529_v63, %v339_v9  ;;  %v398_v9 = vld [vmem:[#allocation10] sm:$0xff] }
 0x160   :  { %1402 = vmatmul.msk.f32.vlgmr.msra.gmra.mxu1 %vm269_vm0, %v357_v12  ;;  %v341_v16 = vadd.f32 %v1529_v63, %v340_v14 }
 0x162   :  { %v345_v19 = vsel %vm344_vm12, %v1529_v63, %v341_v16 }
 0x163   :  { %v350_v20 = vsel %vm347_vm13, %v349_v13, %v345_v19 }
 0x164   :  { %v355_v21 = vmul.f32 %v353_v17, %v350_v20 }
 0x166   :  { %v358_v22 = vadd.f32 %v1508_v5, %v355_v21 }
 0x168   :  { %1403 = vmatmul.msk.f32.gmra.mxu1 %vm269_vm0, %v358_v22 }
 0x1dd   :  { %v390_v26 = vpop.f32.mrf.mxu1 }
 0x1de   :  { %v2168_v28 = vadd.f32 %v1509_v24, %v390_v26 }
 0x1e0   :  { %v431_v29 = vmul.f32 %v422_v25, %v2168_v28  ;;  %v430_v18 = vmul.f32 %v420_v27, %v2168_v28  ;;  %v432_v30 = vmul.f32 %v424_v23, %v2168_v28  ;;  %v429_v38 = vmul.f32 %v418_v33, %v2168_v28 }
 0x1e1   :  { %v396_v47 = vmul.f32 0.35355338, %v2168_v28 }
 0x1e2   :  { %459 = vrot.lane.b32.xlu2 %v432_v30, %s1906_s5  ;;  %457 = vrot.lane.b32.xlu0 %v431_v29, %s1906_s5 }
 0x1e3   :  { %455 = vrot.lane.b32.xlu1 %v430_v18, %s1906_s5 }
 0x1e5   :  { %v393_v31 = vpop.f32.mrf.mxu1 }
 0x1e6   :  { %v394_v32 = vadd.f32 %v1509_v24, %v393_v31 }
 0x1e8   :  { %v496_v34 = vmul.f32 %v424_v23, %v394_v32  ;;  %v493_v35 = vmul.f32 %v418_v33, %v394_v32  ;;  %v495_v36 = vmul.f32 %v422_v25, %v394_v32  ;;  %v494_v37 = vmul.f32 %v420_v27, %v394_v32 }
 0x1e9   :  { %v397_v48 = vmul.f32 0.35355338, %v394_v32 }
 0x1ea   :  { %511 = vrot.lane.b32.xlu2 %v496_v34, %s1906_s5  ;;  %505 = vrot.lane.b32.xlu0 %v493_v35, %s1906_s5 }
 0x1f2   :  { %509 = vrot.lane.b32.xlu2 %v495_v36, %s1906_s5 }
 0x1fa   :  { %507 = vrot.lane.b32.xlu2 %v494_v37, %s1906_s5 }
 0x202   :  { %453 = vrot.lane.b32.xlu2 %v429_v38, %s1906_s5 }
 0x20a   :  { %439 = vrot.lane.b32.xlu2 %v2140_v45, %s1907_s9 }
 0x212   :  { %437 = vrot.lane.b32.xlu2 %v2151_v52, %s1907_s9 }
 0x21a   :  { %435 = vrot.lane.b32.xlu2 %v2130_v43, %s1907_s9 }
 0x222   :  { %433 = vrot.lane.b32.xlu2 %v2135_v44, %s1907_s9 }
 0x23c   :  { %v460_v39 = vpop.permute.xlu2 %459 }
 0x23d   :  { %1404 = vmatpush.xpose.msk.msrb.mxu1 %vm269_vm0, %v460_v39 }
 0x244   :  { %v512_v40 = vpop.permute.xlu2 %511 }
 0x245   :  { %1409 = vmatpush.xpose.msk.msra.mxu2 %vm269_vm0, %v512_v40 }
 0x24c   :  { %v510_v41 = vpop.permute.xlu2 %509 }
 0x24d   :  { %1410 = vmatpush.xpose.msk.msra.mxu2 %vm269_vm0, %v510_v41 }
 0x254   :  { %v508_v42 = vpop.permute.xlu2 %507  ;;  %v458_v45 = vpop.permute.xlu0 %457 }
 0x255   :  { %1405 = vmatpush.xpose.msk.msrb.mxu1 %vm269_vm0, %v458_v45  ;;  %1411 = vmatpush.xpose.msk.msra.mxu2 %vm269_vm0, %v508_v42  ;;  %v456_v46 = vpop.permute.xlu1 %455 }
 0x259   :  { %1406 = vmatpush.xpose.msk.msrb.mxu1 %vm269_vm0, %v456_v46 }
 0x25c   :  { %v454_v43 = vpop.permute.xlu2 %453  ;;  %v506_v44 = vpop.permute.xlu0 %505 }
 0x25d   :  { %1407 = vmatpush.xpose.msk.msrb.mxu1 %vm269_vm0, %v454_v43  ;;  %1412 = vmatpush.xpose.msk.msra.mxu2 %vm269_vm0, %v506_v44 }
 0x260   :  { %1408 = vmatmul.msk.f32.vlgmr.msrb.gmra.mxu1 %vm269_vm0, %v396_v47  ;;  %1413 = vmatmul.msk.f32.vlgmr.msra.gmra.mxu2 %vm269_vm0, %v397_v48 }
 0x264   :  { %v440_v52 = vpop.permute.xlu2 %439 }
 0x265   :  { %v448_v54 = vmul.f32 %v440_v52, %v2168_v28  ;;  %v500_v55 = vmul.f32 %v440_v52, %v394_v32 }
 0x26c   :  { %v438_v53 = vpop.permute.xlu2 %437 }
 0x26d   :  { %v499_v56 = vmul.f32 %v438_v53, %v394_v32  ;;  %v447_v57 = vmul.f32 %v438_v53, %v2168_v28 }
 0x26f   :  { %v1477_v58 = vpack.i.bf16 %v499_v56, %v500_v55  ;;  %v1467_v59 = vpack.i.bf16 %v447_v57, %v448_v54 }
 0x271   :  { %1468 = vrot.lane.b32.xlu2 %v1467_v59, %s1907_s9 }
 0x274   :  { %v436_v60 = vpop.permute.xlu2 %435 }
 0x275   :  { %v498_v62 = vmul.f32 %v436_v60, %v394_v32  ;;  %v446_v20 = vmul.f32 %v436_v60, %v2168_v28 }
 0x27c   :  { %v434_v61 = vpop.permute.xlu2 %433 }
 0x27d   :  { %v497_v63 = vmul.f32 %v434_v61, %v394_v32  ;;  %v445_v19 = vmul.f32 %v434_v61, %v2168_v28 }
 0x27f   :  { %v1482_v1 = vpack.i.bf16 %v497_v63, %v498_v62  ;;  %v1472_v21 = vpack.i.bf16 %v445_v19, %v446_v20  ;;  %v411_v62 = vld [vmem:[#allocation16 + $0x18] sm:$0xff]  ;;  %v410_v63 = vld [vmem:[#allocation16 + $0x10] sm:$0xff] }
 0x280   :  { %723 = vmatpush.msrb.mxu2 %v411_v62 }
 0x281   :  { %1483 = vrot.lane.b32.xlu2 %v1482_v1, %s1907_s9  ;;  %v409_v1 = vld [vmem:[#allocation16 + $0x8] sm:$0xff] }
 0x282   :  { %724 = vmatpush.msrb.mxu2 %v410_v63 }
 0x284   :  { %725 = vmatpush.msrb.mxu2 %v409_v1 }
 0x286   :  { %726 = vmatpush.msrb.mxu2 %v408_v3 }
 0x2cb   :  { %v1469_v4 = vpop.permute.xlu2 %1468 }
 0x2cc   :  { %v1470_v5 = vunpack.i.l.bf16 %v1469_v4  ;;  %v1471_v6 = vunpack.i.h.bf16 %v1469_v4 }
 0x2ce   :  { %651 = vmatpush.msrb.mxu0 %v1470_v5 }
 0x2d0   :  { %652 = vmatpush.msrb.mxu0 %v1471_v6 }
 0x2db   :  { %v1484_v33 = vpop.permute.xlu2 %1483 }
 0x2dc   :  { %v1485_v36 = vunpack.i.l.bf16 %v1484_v33  ;;  %v1486_v37 = vunpack.i.h.bf16 %v1484_v33  ;;  %v822_v33 = vld [vmem:[#allocation19 + $0x10] sm:$0xff] }
 0x2dd   :  { %v489_v7 = vpop.f32.mrf.mxu1 }
 0x2de   :  { %492 = vst.msk [vmem:[#allocation2] sm:$0xff] %vm269_vm0, %v489_v7 }
 0x2e3   :  { %v541_v8 = vpop.f32.mrf.mxu2 }
 0x2e4   :  { %544 = vst.msk [vmem:[#allocation2 + $0x8] sm:$0xff] %vm269_vm0, %v541_v8  ;;  %v1510_v8 = vld [vmem:[#allocation17] ss:$0 sm:$0xff] }
 0x2e5   :  { %v545_v11 = vld [vmem:[#allocation2] sm:$0xff] }
 0x2e6   :  { %v547_v12 = vadd.f32 %v545_v11, %v398_v9 }
 0x2e8   :  { %v549_v14 = vsel %vm269_vm0, %v547_v12, -inf }
 0x2e9   :  { %550 = vmax.xlane.f32.xlu1 %v549_v14 }
 0x2eb   :  { %v546_v16 = vld [vmem:[#allocation2 + $0x8] sm:$0xff] }
 0x2ec   :  { %v548_v13 = vadd.f32 %v546_v16, %v399_v15 }
 0x2ee   :  { %v552_v17 = vsel %vm269_vm0, %v548_v13, -inf }
 0x2ef   :  { %553 = vmax.xlane.f32.xlu0 %v552_v17 }
 0x302   :  { %1473 = vrot.lane.b32.xlu1 %v1472_v21, %s1907_s9 }
 0x303   :  { %1478 = vrot.lane.b32.xlu0 %v1477_v58, %s1907_s9 }
 0x35c   :  { %v551_v22 = vpop.xlane.xlu1 %550 }
 0x35d   :  { %v555_v23 = vsub.f32 %v547_v12, %v551_v22 }
 0x35f   :  { %v557_v24 = vmul.f32 1.442695, %v555_v23 }
 0x361   :  { %1530 = vpow2.f32 %v557_v24 }
 0x362   :  { %v554_v25 = vpop.xlane.xlu0 %553 }
 0x363   :  { %v556_v26 = vsub.f32 %v548_v13, %v554_v25 }
 0x365   :  { %v559_v27 = vmul.f32 1.442695, %v556_v26 }
 0x367   :  { %v1531_v29 = vpop.eup %1530  ;;  %1532 = vpow2.f32 %v559_v27  ;;  %v862_v27 = vld [vmem:[#allocation20 + $0x18] sm:$0xff] }
 0x368   :  { %1414 = vmatmul.msk.f32.vlgmr.msra.gmra.mxu0 %vm269_vm0, %v1531_v29 }
 0x36d   :  { %v1533_v18 = vpop.eup %1532 }
 0x36e   :  { %1415 = vmatmul.msk.f32.vlgmr.msra.gmra.mxu3 %vm269_vm0, %v1533_v18 }
 0x374   :  { %v1474_v28 = vpop.permute.xlu1 %1473 }
 0x375   :  { %v1479_v30 = vpop.permute.xlu0 %1478  ;;  %v1475_v31 = vunpack.i.l.bf16 %v1474_v28  ;;  %v1476_v34 = vunpack.i.h.bf16 %v1474_v28  ;;  %v859_v28 = vld [vmem:[#allocation20] sm:$0xff] }
 0x376   :  { %v1480_v32 = vunpack.i.l.bf16 %v1479_v30  ;;  %v1481_v35 = vunpack.i.h.bf16 %v1479_v30  ;;  %v265_v30 = vld [vmem:[#allocation8] sm:$0xff] }
 0x377   :  { %653 = vmatpush.msrb.mxu0 %v1475_v31 }
 0x378   :  { %691 = vmatpush.msra.mxu1 %v1480_v32  ;;  %v823_v32 = vld [vmem:[#allocation19 + $0x18] sm:$0xff] }
 0x379   :  { %654 = vmatpush.msrb.mxu0 %v1476_v34  ;;  %846 = vmatpush.msrb.mxu3 %v823_v32  ;;  %v1513_v32 = vld [vmem:[%s2443_s15] ss:$0 sm:$0xff] }
 0x37a   :  { %692 = vmatpush.msra.mxu1 %v1481_v35  ;;  %v2261_v35 = vld [vmem:[%s2474_s10 + $0x18] sm:$0xff] }
 0x37b   :  { %885 = vmatpush.msra.mxu0 %v862_v27  ;;  %847 = vmatpush.msrb.mxu3 %v822_v33 }
 0x37c   :  { %693 = vmatpush.msra.mxu1 %v1485_v36  ;;  %v821_v36 = vld [vmem:[#allocation19 + $0x8] sm:$0xff] }
 0x37d   :  { %848 = vmatpush.msrb.mxu3 %v821_v36  ;;  %v900_v36 = vld [vmem:[%s2474_s10 + $0x10] sm:$0xff] }
 0x37e   :  { %694 = vmatpush.msra.mxu1 %v1486_v37  ;;  %v266_v37 = vld [vmem:[#allocation8 + $0x8] sm:$0xff] }
 0x3e5   :  { %v584_v38 = vpop.f32.mrf.mxu0 }
 0x3e6   :  { %1534 = vrcp.f32 %v584_v38  ;;  %v601_v42 = vand.u32 2147483648, %v584_v38  ;;  %v599_v46 = vand.u32 2147483647, %v584_v38  ;;  %vm595_vm15 = vweird.f32 %v584_v38 }
 0x3e8   :  { %v602_v47 = vor.u32 1.1754944e-38, %v601_v42  ;;  %vm600_vm2 = vcmp.eq.f32.partialorder %v599_v46, 8.507059e+37 }
 0x3ec   :  { %v1535_v39 = vpop.eup %1534 }
 0x3ed   :  { %v591_v40 = vmul.f32 %v1535_v39, %v584_v38  ;;  %vm596_vm14 = vweird.f32 %v1535_v39  ;;  %v820_v38 = vld [vmem:[#allocation19] sm:$0xff] }
 0x3ee   :  { %vm597_vm1 = vmor %vm595_vm15, %vm596_vm14  ;;  %849 = vmatpush.msrb.mxu3 %v820_v38  ;;  %v899_v38 = vld [vmem:[%s2474_s10 + $0x8] sm:$0xff] }
 0x3ef   :  { %v592_v41 = vsub.f32 1.0, %v591_v40 }
 0x3f1   :  { %v593_v45 = vmul.f32 %v1535_v39, %v592_v41  ;;  %v587_v43 = vpop.f32.mrf.mxu3 }
 0x3f2   :  { %1536 = vrcp.f32 %v587_v43  ;;  %v615_v54 = vand.u32 2147483648, %v587_v43  ;;  %v613_v56 = vand.u32 2147483647, %v587_v43  ;;  %vm609_vm4 = vweird.f32 %v587_v43 }
 0x3f3   :  { %v594_v44 = vadd.f32 %v1535_v39, %v593_v45 }
 0x3f4   :  { %v616_v58 = vor.u32 1.1754944e-38, %v615_v54  ;;  %vm614_vm6 = vcmp.eq.f32.partialorder %v613_v56, 8.507059e+37 }
 0x3f5   :  { %v598_v48 = vsel %vm597_vm1, %v1535_v39, %v594_v44 }
 0x3f6   :  { %v603_v49 = vsel %vm600_vm2, %v602_v47, %v598_v48 }
 0x3f7   :  { %v618_v50 = vmul.f32 %v1531_v29, %v603_v49  ;;  %v861_v29 = vld [vmem:[#allocation20 + $0x10] sm:$0xff] }
 0x3f8   :  { %v1537_v51 = vpop.eup %1536  ;;  %886 = vmatpush.msra.mxu0 %v861_v29 }
 0x3f9   :  { %v605_v52 = vmul.f32 %v1537_v51, %v587_v43  ;;  %1416 = vmatmul.msk.f32.vlgmr.msrb.gmra.mxu0 %vm269_vm0, %v618_v50  ;;  %vm610_vm3 = vweird.f32 %v1537_v51  ;;  %v2269_v43 = vld [vmem:[%s2474_s10] sm:$0xff] }
 0x3fa   :  { %vm611_vm5 = vmor %vm609_vm4, %vm610_vm3 }
 0x3fb   :  { %v606_v53 = vsub.f32 1.0, %v605_v52 }
 0x3fd   :  { %v607_v55 = vmul.f32 %v1537_v51, %v606_v53 }
 0x3ff   :  { %v608_v57 = vadd.f32 %v1537_v51, %v607_v55 }
 0x401   :  { %v612_v59 = vsel %vm611_vm5, %v1537_v51, %v608_v57 }
 0x402   :  { %v617_v60 = vsel %vm614_vm6, %v616_v58, %v612_v59 }
 0x403   :  { %v619_v61 = vmul.f32 %v1533_v18, %v617_v60  ;;  %v860_v18 = vld [vmem:[#allocation20 + $0x8] sm:$0xff] }
 0x404   :  { %887 = vmatpush.msra.mxu0 %v860_v18 }
 0x405   :  { %1417 = vmatmul.msk.f32.vlgmr.msra.gmra.mxu1 %vm269_vm0, %v619_v61 }
 0x406   :  { %888 = vmatpush.msra.mxu0 %v859_v28 }
 0x407   :  { %1422 = vmatmul.msk.f32.vlgmr.msra.gmra.mxu0 %vm269_vm0, %v265_v30 }
 0x40f   :  { %1423 = vmatmul.msk.f32.gmra.mxu0 %vm269_vm0, %v266_v37 }
 0x476   :  { %v656_v4 = vpop.f32.mrf.mxu0 }
 0x477   :  { %659 = vst.msk [vmem:[#allocation4] sm:$0xff] %vm269_vm0, %v656_v4 }
 0x47e   :  { %v700_v5 = vld [vmem:[#allocation4] sm:$0xff] }
 0x47f   :  { %1418 = vmatmul.msk.f32.vlgmr.msrb.gmra.mxu2 %vm269_vm0, %v700_v5 }
 0x482   :  { %v696_v6 = vpop.f32.mrf.mxu1 }
 0x483   :  { %699 = vst.msk [vmem:[#allocation4 + $0x8] sm:$0xff] %vm269_vm0, %v696_v6  ;;  %v1511_v6 = vld [vmem:[%s2450_s22 + $0x1] ss:$0 sm:$0xff] }
 0x484   :  { %v890_v33 = vpop.f32.mrf.mxu0 }
 0x48a   :  { %v701_v7 = vld [vmem:[#allocation4 + $0x8] sm:$0xff] }
 0x48b   :  { %1419 = vmatmul.msk.f32.gmra.mxu2 %vm269_vm0, %v701_v7 }
 0x502   :  { %v728_v9 = vpop.f32.mrf.mxu2 }
 0x503   :  { %v729_v11 = vadd.f32 %v1510_v8, %v728_v9 }
 0x505   :  { %v2234_v12 = vadd.f32 %v729_v11, %v2103_v0 }
 0x507   :  { %v738_v14 = vsel %vm269_vm0, %v2234_v12, 0.0 }
 0x508   :  { %739 = vadd.xlane.f32.xlu2 %v738_v14 }
 0x50e   :  { %v731_v15 = vpop.f32.mrf.mxu2 }
 0x50f   :  { %v732_v16 = vadd.f32 %v1510_v8, %v731_v15 }
 0x511   :  { %v2239_v13 = vadd.f32 %v732_v16, %v2107_v2  ;;  %v1512_v16 = vld [vmem:[%s2451_s23 + $0x1] ss:$0 sm:$0xff] }
 0x513   :  { %v741_v17 = vsel %vm269_vm0, %v2239_v13, 0.0 }
 0x514   :  { %742 = vadd.xlane.f32.xlu0 %v741_v17 }
 0x57b   :  { %v740_v19 = vpop.xlane.xlu2 %739 }
 0x57c   :  { %v744_v20 = vmul.f32 %v740_v19, %v2111_v10 }
 0x57e   :  { %v2245_v21 = vsub.f32 %v2234_v12, %v744_v20 }
 0x580   :  { %v748_v0 = vmul.f32 %v2245_v21, %v2245_v21  ;;  %v813_v14 = vmul.f32 %v1511_v6, %v2245_v21 }
 0x582   :  { %v750_v22 = vsel %vm269_vm0, %v748_v0, 0.0 }
 0x583   :  { %751 = vadd.xlane.f32.xlu1 %v750_v22 }
 0x587   :  { %v743_v23 = vpop.xlane.xlu0 %742 }
 0x588   :  { %v745_v2 = vmul.f32 %v743_v23, %v2111_v10 }
 0x58a   :  { %v2252_v24 = vsub.f32 %v2239_v13, %v745_v2 }
 0x58c   :  { %v749_v25 = vmul.f32 %v2252_v24, %v2252_v24  ;;  %v814_v29 = vmul.f32 %v1511_v6, %v2252_v24 }
 0x58e   :  { %v753_v26 = vsel %vm269_vm0, %v749_v25, 0.0 }
 0x58f   :  { %754 = vadd.xlane.f32.xlu2 %v753_v26 }
 0x59c   :  { %925 = vrot.lane.b32.xlu1 %v2261_v35, %s1905_s0 }
 0x5a4   :  { %919 = vrot.lane.b32.xlu1 %v2269_v43, %s1905_s0 }
 0x5f6   :  { %v752_v31 = vpop.xlane.xlu1 %751 }
 0x5f7   :  { %v756_v34 = vmul.f32 0.032258064, %v752_v31 }
 0x5f9   :  { %1538 = vrsqrt.f32 %v756_v34  ;;  %vm765_vm7 = vcmp.eq.f32.partialorder %v756_v34, inf  ;;  %v768_v50 = vand.u32 2147483648, %v756_v34  ;;  %vm767_vm8 = vcmp.eq.f32.partialorder %v756_v34, 0.0 }
 0x5ff   :  { %v1539_v39 = vpop.eup %1538 }
 0x600   :  { %v759_v40 = vmul.f32 %v1539_v39, %v756_v34 }
 0x602   :  { %v760_v41 = vmul.f32 %v1539_v39, %v759_v40  ;;  %v755_v42 = vpop.xlane.xlu2 %754 }
 0x603   :  { %v757_v45 = vmul.f32 0.032258064, %v755_v42 }
 0x604   :  { %v761_v46 = vmul.f32 0.5, %v760_v41 }
 0x605   :  { %1540 = vrsqrt.f32 %v757_v45  ;;  %vm777_vm9 = vcmp.eq.f32.partialorder %v757_v45, inf  ;;  %v780_v61 = vand.u32 2147483648, %v757_v45  ;;  %vm779_vm10 = vcmp.eq.f32.partialorder %v757_v45, 0.0 }
 0x606   :  { %v762_v44 = vsub.f32 1.5, %v761_v46 }
 0x608   :  { %v763_v47 = vmul.f32 %v1539_v39, %v762_v44  ;;  %v893_v39 = vpop.f32.mrf.mxu0 }
 0x609   :  { %v2298_v40 = vadd.f32 %v1513_v32, %v893_v39 }
 0x60a   :  { %v764_v48 = vmul.f32 %v763_v47, %v756_v34  ;;  %v1514_v47 = vld [vmem:[%s2441_s13] ss:$0 sm:$0xff] }
 0x60b   :  { %v1541_v49 = vpop.eup %1540  ;;  %v974_v42 = vmul.f32 %v2261_v35, %v2298_v40  ;;  %v973_v46 = vmul.f32 %v900_v36, %v2298_v40  ;;  %v972_v44 = vmul.f32 %v899_v38, %v2298_v40 }
 0x60c   :  { %v766_v51 = vsel %vm765_vm7, %v756_v34, %v764_v48  ;;  %v771_v52 = vmul.f32 %v1541_v49, %v757_v45  ;;  %v2286_v34 = vadd.f32 %v1513_v32, %v890_v33 }
 0x60d   :  { %v769_v53 = vsel %vm767_vm8, %v768_v50, %v766_v51  ;;  %1429 = vmatpush.xpose.msk.msra.mxu2 %vm269_vm0, %v974_v42 }
 0x60e   :  { %v772_v54 = vmul.f32 %v1541_v49, %v771_v52  ;;  %v782_v55 = vadd.f32 1e-06, %v769_v53  ;;  %v914_v24 = vmul.f32 %v2261_v35, %v2286_v34  ;;  %v913_v37 = vmul.f32 %v900_v36, %v2286_v34 }
 0x60f   :  { %v912_v41 = vmul.f32 %v899_v38, %v2286_v34  ;;  %v971_v35 = vmul.f32 %v2269_v43, %v2298_v40 }
 0x610   :  { %v773_v56 = vmul.f32 0.5, %v772_v54  ;;  %1542 = vrcp.f32 %v782_v55  ;;  %v795_v4 = vand.u32 2147483648, %v782_v55  ;;  %v793_v8 = vand.u32 2147483647, %v782_v55  ;;  %1424 = vmatpush.xpose.msk.msrb.mxu1 %vm269_vm0, %v914_v24 }
 0x611   :  { %vm789_vm12 = vweird.f32 %v782_v55  ;;  %1430 = vmatpush.xpose.msk.msra.mxu2 %vm269_vm0, %v973_v46 }
 0x612   :  { %v774_v57 = vsub.f32 1.5, %v773_v56  ;;  %v796_v11 = vor.u32 1.1754944e-38, %v795_v4  ;;  %vm794_vm14 = vcmp.eq.f32.partialorder %v793_v8, 8.507059e+37  ;;  %v902_v4 = vld [vmem:[#allocation13] sm:$0xff]  ;;  %v926_v8 = vpop.permute.xlu1 %925 }
 0x614   :  { %v775_v58 = vmul.f32 %v1541_v49, %v774_v57  ;;  %1425 = vmatpush.xpose.msk.msrb.mxu1 %vm269_vm0, %v913_v37 }
 0x615   :  { %1431 = vmatpush.xpose.msk.msra.mxu2 %vm269_vm0, %v972_v44 }
 0x616   :  { %v1543_v59 = vpop.eup %1542  ;;  %v776_v60 = vmul.f32 %v775_v58, %v757_v45 }
 0x617   :  { %v785_v62 = vmul.f32 %v1543_v59, %v782_v55  ;;  %vm790_vm11 = vweird.f32 %v1543_v59 }
 0x618   :  { %v778_v63 = vsel %vm777_vm9, %v757_v45, %v776_v60  ;;  %vm791_vm13 = vmor %vm789_vm12, %vm790_vm11  ;;  %1426 = vmatpush.xpose.msk.msrb.mxu1 %vm269_vm0, %v912_v41  ;;  %v911_v45 = vmul.f32 %v2269_v43, %v2286_v34  ;;  %v896_v43 = vld [vmem:[#allocation11] sm:$0xff] }
 0x619   :  { %v786_v1 = vsub.f32 1.0, %v785_v62  ;;  %v781_v3 = vsel %vm779_vm10, %v780_v61, %v778_v63  ;;  %1432 = vmatpush.xpose.msk.msra.mxu2 %vm269_vm0, %v971_v35  ;;  %v905_v63 = vld [vmem:[#allocation13 + $0x18] sm:$0xff] }
 0x61a   :  { %v783_v5 = vadd.f32 1e-06, %v781_v3  ;;  %1049 = vmatpush.msra.mxu3 %v905_v63  ;;  %v903_v3 = vld [vmem:[#allocation13 + $0x8] sm:$0xff] }
 0x61b   :  { %v787_v7 = vmul.f32 %v1543_v59, %v786_v1  ;;  %v904_v1 = vld [vmem:[#allocation13 + $0x10] sm:$0xff] }
 0x61c   :  { %1544 = vrcp.f32 %v783_v5  ;;  %v809_v2 = vand.u32 2147483648, %v783_v5  ;;  %v807_v26 = vand.u32 2147483647, %v783_v5  ;;  %vm803_vm1 = vweird.f32 %v783_v5  ;;  %1427 = vmatpush.xpose.msk.msrb.mxu1 %vm269_vm0, %v911_v45  ;;  %1050 = vmatpush.msra.mxu3 %v904_v1 }
 0x61d   :  { %v788_v9 = vadd.f32 %v1543_v59, %v787_v7 }
 0x61e   :  { %v810_v21 = vor.u32 1.1754944e-38, %v809_v2  ;;  %vm808_vm3 = vcmp.eq.f32.partialorder %v807_v26, 8.507059e+37  ;;  %1051 = vmatpush.msra.mxu3 %v903_v3 }
 0x61f   :  { %v792_v15 = vsel %vm791_vm13, %v1543_v59, %v788_v9  ;;  %v897_v59 = vld [vmem:[#allocation11 + $0x8] sm:$0xff] }
 0x620   :  { %v797_v17 = vsel %vm794_vm14, %v796_v11, %v792_v15  ;;  %1052 = vmatpush.msra.mxu3 %v902_v4  ;;  %v934_v11 = vmul.f32 %v926_v8, %v2286_v34  ;;  %v909_v4 = vld [vmem:[#allocation22 + $0x18] sm:$0xff] }
 0x621   :  { %v815_v19 = vmul.f32 %v813_v14, %v797_v17  ;;  %v978_v14 = vmul.f32 %v926_v8, %v2298_v40  ;;  %1193 = vmatpush.msrb.mxu2 %v909_v4 }
 0x622   :  { %v1545_v20 = vpop.eup %1544 }
 0x623   :  { %v818_v0 = vadd.f32 %v1512_v16, %v815_v19  ;;  %v799_v22 = vmul.f32 %v1545_v20, %v783_v5  ;;  %vm804_vm15 = vweird.f32 %v1545_v20 }
 0x624   :  { %vm805_vm2 = vmor %vm803_vm1, %vm804_vm15 }
 0x625   :  { %1420 = vmatmul.msk.f32.vlgmr.msrb.gmra.mxu3 %vm269_vm0, %v818_v0  ;;  %v800_v23 = vsub.f32 1.0, %v799_v22 }
 0x627   :  { %v801_v25 = vmul.f32 %v1545_v20, %v800_v23 }
 0x629   :  { %v802_v27 = vadd.f32 %v1545_v20, %v801_v25  ;;  %v920_v25 = vpop.permute.xlu1 %919 }
 0x62b   :  { %v806_v18 = vsel %vm805_vm2, %v1545_v20, %v802_v27  ;;  %v931_v27 = vmul.f32 %v920_v25, %v2286_v34 }
 0x62c   :  { %v811_v28 = vsel %vm808_vm3, %v810_v21, %v806_v18  ;;  %v975_v21 = vmul.f32 %v920_v25, %v2298_v40 }
 0x62d   :  { %v816_v30 = vmul.f32 %v814_v29, %v811_v28 }
 0x62f   :  { %v819_v31 = vadd.f32 %v1512_v16, %v816_v30 }
 0x631   :  { %1421 = vmatmul.msk.f32.gmra.mxu3 %vm269_vm0, %v819_v31 }
 0x6a8   :  { %v851_v48 = vpop.f32.mrf.mxu3 }
 0x6a9   :  { %v852_v49 = vadd.f32 %v1514_v47, %v851_v48 }
 0x6ab   :  { %v857_v50 = vmul.f32 0.35355338, %v852_v49 }
 0x6ad   :  { %1428 = vmatmul.msk.f32.vlgmr.msrb.gmra.mxu1 %vm269_vm0, %v857_v50 }
 0x6b4   :  { %v854_v51 = vpop.f32.mrf.mxu3 }
 0x6b5   :  { %v855_v52 = vadd.f32 %v1514_v47, %v854_v51 }
 0x6b7   :  { %v858_v53 = vmul.f32 0.35355338, %v855_v52 }
 0x6b9   :  { %1433 = vmatmul.msk.f32.vlgmr.msra.gmra.mxu2 %vm269_vm0, %v858_v53 }
 0x72a   :  { %v967_v54 = vpop.f32.mrf.mxu1 }
 0x72b   :  { %970 = vst.msk [vmem:[#allocation3] sm:$0xff] %vm269_vm0, %v967_v54 }
 0x732   :  { %v1015_v55 = vld [vmem:[#allocation3] sm:$0xff] }
 0x733   :  { %v1017_v56 = vadd.f32 %v1015_v55, %v896_v43 }
 0x735   :  { %v1019_v57 = vsel %vm269_vm0, %v1017_v56, -inf }
 0x736   :  { %1020 = vmax.xlane.f32.xlu2 %v1019_v57 }
 0x73c   :  { %v1011_v58 = vpop.f32.mrf.mxu2 }
 0x73d   :  { %1014 = vst.msk [vmem:[#allocation3 + $0x8] sm:$0xff] %vm269_vm0, %v1011_v58 }
 0x744   :  { %v1016_v60 = vld [vmem:[#allocation3 + $0x8] sm:$0xff] }
 0x745   :  { %v1018_v61 = vadd.f32 %v1016_v60, %v897_v59 }
 0x747   :  { %v1022_v62 = vsel %vm269_vm0, %v1018_v61, -inf }
 0x748   :  { %1023 = vmax.xlane.f32.xlu0 %v1022_v62 }
 0x74e   :  { %923 = vrot.lane.b32.xlu2 %v900_v36, %s1905_s0 }
 0x75c   :  { %921 = vrot.lane.b32.xlu0 %v899_v38, %s1905_s0 }
 0x7a9   :  { %v1021_v5 = vpop.xlane.xlu2 %1020 }
 0x7aa   :  { %v1025_v6 = vsub.f32 %v1017_v56, %v1021_v5  ;;  %v908_v5 = vld [vmem:[#allocation22 + $0x10] sm:$0xff] }
 0x7ab   :  { %1194 = vmatpush.msrb.mxu2 %v908_v5 }
 0x7ac   :  { %v1027_v7 = vmul.f32 1.442695, %v1025_v6  ;;  %v907_v6 = vld [vmem:[#allocation22 + $0x8] sm:$0xff] }
 0x7ad   :  { %1195 = vmatpush.msrb.mxu2 %v907_v6  ;;  %v1332_v6 = vld [vmem:[%s2448_s20 + $0x18] sm:$0xff] }
 0x7ae   :  { %1546 = vpow2.f32 %v1027_v7  ;;  %v906_v7 = vld [vmem:[#allocation22] sm:$0xff] }
 0x7af   :  { %1196 = vmatpush.msrb.mxu2 %v906_v7 }
 0x7b1   :  { %v924_v9 = vpop.permute.xlu2 %923 }
 0x7b2   :  { %v977_v15 = vmul.f32 %v924_v9, %v2298_v40  ;;  %v933_v16 = vmul.f32 %v924_v9, %v2286_v34 }
 0x7b4   :  { %v1547_v17 = vpop.eup %1546  ;;  %v1497_v19 = vpack.i.bf16 %v977_v15, %v978_v14  ;;  %v1487_v20 = vpack.i.bf16 %v933_v16, %v934_v11  ;;  %v1515_v15 = vld [vmem:[%s2445_s17] ss:$0 sm:$0xff]  ;;  %s2475_s17 = sld [smem:[#allocation43_spill]] }
 0x7b5   :  { %1434 = vmatmul.msk.f32.vlgmr.msra.gmra.mxu3 %vm269_vm0, %v1547_v17 }
 0x7b6   :  { %1498 = vrot.lane.b32.xlu1 %v1497_v19, %s1906_s5  ;;  %1488 = vrot.lane.b32.xlu0 %v1487_v20, %s1906_s5 }
 0x7bb   :  { %v1024_v0 = vpop.xlane.xlu0 %1023 }
 0x7bc   :  { %v1026_v22 = vsub.f32 %v1018_v61, %v1024_v0 }
 0x7be   :  { %v1029_v23 = vmul.f32 1.442695, %v1026_v22 }
 0x7c0   :  { %1548 = vpow2.f32 %v1029_v23 }
 0x7c6   :  { %v2334_v2 = vpop.eup %1548 }
 0x7c7   :  { %1435 = vmatmul.msk.f32.gmra.mxu3 %vm269_vm0, %v2334_v2 }
 0x7ce   :  { %v922_v26 = vpop.permute.xlu0 %921 }
 0x7cf   :  { %v976_v29 = vmul.f32 %v922_v26, %v2298_v40  ;;  %v932_v18 = vmul.f32 %v922_v26, %v2286_v34 }
 0x7d1   :  { %v1502_v28 = vpack.i.bf16 %v975_v21, %v976_v29  ;;  %v1492_v30 = vpack.i.bf16 %v931_v27, %v932_v18 }
 0x7d3   :  { %1493 = vrot.lane.b32.xlu2 %v1492_v30, %s1906_s5  ;;  %1503 = vrot.lane.b32.xlu0 %v1502_v28, %s1906_s5  ;;  %s1383_s5 = sshll.u32 %s2475_s17, 4  ;;  %s1384_s5 = int_to_ptr.hbm [resolvable:$true] %s1383_s5 }
 0x828   :  { %v1499_v31 = vpop.permute.xlu1 %1498  ;;  %v1489_v32 = vpop.permute.xlu0 %1488 }
 0x829   :  { %v1500_v33 = vunpack.i.l.bf16 %v1499_v31  ;;  %v1490_v36 = vunpack.i.l.bf16 %v1489_v32  ;;  %v1501_v24 = vunpack.i.h.bf16 %v1499_v31  ;;  %v1491_v37 = vunpack.i.h.bf16 %v1489_v32 }
 0x82b   :  { %1121 = vmatpush.msrb.mxu0 %v1490_v36  ;;  %1161 = vmatpush.msra.mxu1 %v1500_v33  ;;  %v1293_v33 = vld [vmem:[#allocation23 + $0x18] sm:$0xff]  ;;  %v1292_v36 = vld [vmem:[#allocation23 + $0x10] sm:$0xff] }
 0x82d   :  { %1122 = vmatpush.msrb.mxu0 %v1491_v37  ;;  %1162 = vmatpush.msra.mxu1 %v1501_v24  ;;  %v1494_v38 = vpop.permute.xlu2 %1493 }
 0x82e   :  { %v1495_v39 = vunpack.i.l.bf16 %v1494_v38  ;;  %v1496_v40 = vunpack.i.h.bf16 %v1494_v38  ;;  %v1291_v38 = vld [vmem:[#allocation23 + $0x8] sm:$0xff] }
 0x830   :  { %1123 = vmatpush.msrb.mxu0 %v1495_v39  ;;  %v1290_v39 = vld [vmem:[#allocation23] sm:$0xff] }
 0x832   :  { %1124 = vmatpush.msrb.mxu0 %v1496_v40 }
 0x834   :  { %1316 = vmatpush.msra.mxu0 %v1293_v33  ;;  %v1331_v33 = vld [vmem:[%s2448_s20 + $0x10] sm:$0xff] }
 0x836   :  { %1317 = vmatpush.msra.mxu0 %v1292_v36  ;;  %v1330_v36 = vld [vmem:[%s2448_s20 + $0x8] sm:$0xff] }
 0x838   :  { %v1054_v34 = vpop.f32.mrf.mxu3  ;;  %1318 = vmatpush.msra.mxu0 %v1291_v38 }
 0x839   :  { %1550 = vrcp.f32 %v1054_v34  ;;  %v1071_v46 = vand.u32 2147483648, %v1054_v34  ;;  %v1069_v35 = vand.u32 2147483647, %v1054_v34  ;;  %vm1065_vm5 = vweird.f32 %v1054_v34 }
 0x83a   :  { %1319 = vmatpush.msra.mxu0 %v1290_v39 }
 0x83b   :  { %v1072_v50 = vor.u32 1.1754944e-38, %v1071_v46  ;;  %vm1070_vm7 = vcmp.eq.f32.partialorder %v1069_v35, 8.507059e+37 }
 0x83f   :  { %v1551_v41 = vpop.eup %1550 }
 0x840   :  { %v1061_v42 = vmul.f32 %v1551_v41, %v1054_v34  ;;  %vm1066_vm4 = vweird.f32 %v1551_v41 }
 0x841   :  { %vm1067_vm6 = vmor %vm1065_vm5, %vm1066_vm4 }
 0x842   :  { %v1062_v45 = vsub.f32 1.0, %v1061_v42 }
 0x844   :  { %v1063_v44 = vmul.f32 %v1551_v41, %v1062_v45 }
 0x845   :  { %v1504_v47 = vpop.permute.xlu0 %1503 }
 0x846   :  { %v1064_v48 = vadd.f32 %v1551_v41, %v1063_v44  ;;  %v1505_v49 = vunpack.i.l.bf16 %v1504_v47  ;;  %v1506_v52 = vunpack.i.h.bf16 %v1504_v47 }
 0x848   :  { %v1068_v51 = vsel %vm1067_vm6, %v1551_v41, %v1064_v48  ;;  %1163 = vmatpush.msra.mxu1 %v1505_v49 }
 0x849   :  { %v1073_v53 = vsel %vm1070_vm7, %v1072_v50, %v1068_v51 }
 0x84a   :  { %v1057_v54 = vpop.f32.mrf.mxu3  ;;  %1164 = vmatpush.msra.mxu1 %v1506_v52  ;;  %v1088_v43 = vmul.f32 %v1547_v17, %v1073_v53 }
 0x84b   :  { %1552 = vrcp.f32 %v1057_v54  ;;  %v1085_v58 = vand.u32 2147483648, %v1057_v54  ;;  %v1083_v60 = vand.u32 2147483647, %v1057_v54  ;;  %vm1079_vm9 = vweird.f32 %v1057_v54 }
 0x84c   :  { %1436 = vmatmul.msk.f32.vlgmr.msrb.gmra.mxu0 %vm269_vm0, %v1088_v43  ;;  %v1336_v43 = vld [vmem:[%s2448_s20 + $0x38] sm:$0xff] }
 0x84d   :  { %v1086_v62 = vor.u32 1.1754944e-38, %v1085_v58  ;;  %vm1084_vm11 = vcmp.eq.f32.partialorder %v1083_v60, 8.507059e+37  ;;  %1352 = vmatpush.msrb.mxu3 %v1336_v43  ;;  %v1334_v58 = vld [vmem:[%s2448_s20 + $0x28] sm:$0xff] }
 0x851   :  { %v1553_v55 = vpop.eup %1552 }
 0x852   :  { %v1075_v56 = vmul.f32 %v1553_v55, %v1057_v54  ;;  %vm1080_vm8 = vweird.f32 %v1553_v55 }
 0x853   :  { %vm1081_vm10 = vmor %vm1079_vm9, %vm1080_vm8  ;;  %vm1337_vm9 = vcmask 523264  }
 0x854   :  { %v1076_v57 = vsub.f32 1.0, %v1075_v56 }
 0x856   :  { %v1077_v59 = vmul.f32 %v1553_v55, %v1076_v57 }
 0x858   :  { %v1078_v61 = vadd.f32 %v1553_v55, %v1077_v59 }
 0x85a   :  { %v1082_v63 = vsel %vm1081_vm10, %v1553_v55, %v1078_v61  ;;  %v1335_v55 = vld [vmem:[%s2448_s20 + $0x30] sm:$0xff]  ;;  %v1516_v61 = vld [vmem:[%s2450_s22 + $0x2] ss:$0 sm:$0xff] }
 0x85b   :  { %v1087_v1 = vsel %vm1084_vm11, %v1086_v62, %v1082_v63  ;;  %1353 = vmatpush.msrb.mxu3 %v1335_v55 }
 0x85c   :  { %v1089_v3 = vmul.f32 %v2334_v2, %v1087_v1  ;;  %v1333_v1 = vld [vmem:[%s2448_s20 + $0x20] sm:$0xff] }
 0x85d   :  { %1354 = vmatpush.msrb.mxu3 %v1334_v58 }
 0x85e   :  { %1437 = vmatmul.msk.f32.vlgmr.msra.gmra.mxu1 %vm269_vm0, %v1089_v3 }
 0x85f   :  { %1355 = vmatpush.msrb.mxu3 %v1333_v1 }
 0x861   :  { %1356 = vmatpush.msrb.mxu3 %v1332_v6 }
 0x863   :  { %1357 = vmatpush.msrb.mxu3 %v1331_v33 }
 0x865   :  { %1358 = vmatpush.msrb.mxu3 %v1330_v36 }
 0x8c9   :  { %v1126_v8 = vpop.f32.mrf.mxu0 }
 0x8ca   :  { %1129 = vst.msk [vmem:[#allocation4] sm:$0xff] %vm269_vm0, %v1126_v8 }
 0x8d1   :  { %v1170_v9 = vld [vmem:[#allocation4] sm:$0xff] }
 0x8d2   :  { %1438 = vmatmul.msk.f32.vlgmr.msrb.gmra.mxu2 %vm269_vm0, %v1170_v9 }
 0x8db   :  { %v1166_v11 = vpop.f32.mrf.mxu1 }
 0x8dc   :  { %1169 = vst.msk [vmem:[#allocation4 + $0x8] sm:$0xff] %vm269_vm0, %v1166_v11 }
 0x8e3   :  { %v1171_v14 = vld [vmem:[#allocation4 + $0x8] sm:$0xff] }
 0x8e4   :  { %1439 = vmatmul.msk.f32.gmra.mxu2 %vm269_vm0, %v1171_v14  ;;  %v1517_v14 = vld [vmem:[%s2451_s23 + $0x2] ss:$0 sm:$0xff] }
 0x955   :  { %v1198_v16 = vpop.f32.mrf.mxu2 }
 0x956   :  { %v1199_v17 = vadd.f32 %v1515_v15, %v1198_v16 }
 0x958   :  { %v2355_v19 = vadd.f32 %v1199_v17, %v2234_v12 }
 0x95a   :  { %v1208_v20 = vsel %vm269_vm0, %v2355_v19, 0.0 }
 0x95b   :  { %1209 = vadd.xlane.f32.xlu2 %v1208_v20 }
 0x967   :  { %v1201_v0 = vpop.f32.mrf.mxu2 }
 0x968   :  { %v1202_v22 = vadd.f32 %v1515_v15, %v1201_v0 }
 0x96a   :  { %v2360_v23 = vadd.f32 %v1202_v22, %v2239_v13 }
 0x96c   :  { %v1211_v2 = vsel %vm269_vm0, %v2360_v23, 0.0 }
 0x96d   :  { %1212 = vadd.xlane.f32.xlu1 %v1211_v2 }
 0x9ce   :  { %v1210_v25 = vpop.xlane.xlu2 %1209 }
 0x9cf   :  { %v1214_v26 = vmul.f32 %v1210_v25, %v2111_v10 }
 0x9d1   :  { %v2366_v27 = vsub.f32 %v2355_v19, %v1214_v26 }
 0x9d3   :  { %v1218_v12 = vmul.f32 %v2366_v27, %v2366_v27  ;;  %v1283_v9 = vmul.f32 %v1516_v61, %v2366_v27 }
 0x9d5   :  { %v1220_v21 = vsel %vm269_vm0, %v1218_v12, 0.0 }
 0x9d6   :  { %1221 = vadd.xlane.f32.xlu0 %v1220_v21 }
 0x9e0   :  { %v1213_v29 = vpop.xlane.xlu1 %1212 }
 0x9e1   :  { %v1215_v13 = vmul.f32 %v1213_v29, %v2111_v10 }
 0x9e3   :  { %v2373_v18 = vsub.f32 %v2360_v23, %v1215_v13 }
 0x9e5   :  { %v1219_v28 = vmul.f32 %v2373_v18, %v2373_v18  ;;  %v1284_v13 = vmul.f32 %v1516_v61, %v2373_v18  ;;  %v1329_v18 = vld [vmem:[%s2448_s20] sm:$0xff] }
 0x9e6   :  { %1359 = vmatpush.msrb.mxu3 %v1329_v18 }
 0x9e7   :  { %v1223_v30 = vsel %vm269_vm0, %v1219_v28, 0.0 }
 0x9e8   :  { %1224 = vadd.xlane.f32.xlu2 %v1223_v30 }
 0xa49   :  { %v1222_v31 = vpop.xlane.xlu0 %1221 }
 0xa4a   :  { %v1226_v32 = vmul.f32 0.032258064, %v1222_v31 }
 0xa4c   :  { %1554 = vrsqrt.f32 %v1226_v32  ;;  %vm1235_vm12 = vcmp.eq.f32.partialorder %v1226_v32, inf  ;;  %v1238_v44 = vand.u32 2147483648, %v1226_v32  ;;  %vm1237_vm13 = vcmp.eq.f32.partialorder %v1226_v32, 0.0 }
 0xa52   :  { %v1555_v24 = vpop.eup %1554 }
 0xa53   :  { %v1229_v37 = vmul.f32 %v1555_v24, %v1226_v32 }
 0xa55   :  { %v1230_v10 = vmul.f32 %v1555_v24, %v1229_v37 }
 0xa57   :  { %v1231_v40 = vmul.f32 0.5, %v1230_v10 }
 0xa59   :  { %v1232_v34 = vsub.f32 1.5, %v1231_v40 }
 0xa5b   :  { %v1233_v41 = vmul.f32 %v1555_v24, %v1232_v34  ;;  %v1225_v42 = vpop.xlane.xlu2 %1224  ;;  %v1518_v24 = vld [vmem:[%s2447_s19] ss:$0 sm:$0xff]  ;;  %s1908_s19 = smov [#allocation25]  }
 0xa5c   :  { %v1227_v45 = vmul.f32 0.032258064, %v1225_v42  ;;  %s1381_s20 = sshll.u32 %s1908_s19, 4  ;;  %s1382_s20 = int_to_ptr.vmem [resolvable:$true] %s1381_s20 }
 0xa5d   :  { %v1234_v46 = vmul.f32 %v1233_v41, %v1226_v32  ;;  %v1519_v41 = vld [vmem:[%s2449_s21] ss:$0 sm:$0xff] }
 0xa5e   :  { %1556 = vrsqrt.f32 %v1227_v45  ;;  %vm1247_vm15 = vcmp.eq.f32.partialorder %v1227_v45, inf  ;;  %v1250_v4 = vand.u32 2147483648, %v1227_v45  ;;  %vm1249_vm2 = vcmp.eq.f32.partialorder %v1227_v45, 0.0 }
 0xa5f   :  { %v1236_v35 = vsel %vm1235_vm12, %v1226_v32, %v1234_v46 }
 0xa60   :  { %v1239_v47 = vsel %vm1237_vm13, %v1238_v44, %v1236_v35 }
 0xa61   :  { %v1252_v48 = vadd.f32 1e-06, %v1239_v47 }
 0xa63   :  { %1558 = vrcp.f32 %v1252_v48  ;;  %v1265_v60 = vand.u32 2147483648, %v1252_v48  ;;  %v1263_v63 = vand.u32 2147483647, %v1252_v48  ;;  %vm1259_vm1 = vweird.f32 %v1252_v48 }
 0xa64   :  { %v1557_v49 = vpop.eup %1556 }
 0xa65   :  { %v1241_v50 = vmul.f32 %v1557_v49, %v1227_v45  ;;  %v1266_v8 = vor.u32 1.1754944e-38, %v1265_v60  ;;  %vm1264_vm4 = vcmp.eq.f32.partialorder %v1263_v63, 8.507059e+37 }
 0xa67   :  { %v1242_v51 = vmul.f32 %v1557_v49, %v1241_v50 }
 0xa69   :  { %v1559_v52 = vpop.eup %1558  ;;  %v1243_v53 = vmul.f32 0.5, %v1242_v51 }
 0xa6a   :  { %v1255_v54 = vmul.f32 %v1559_v52, %v1252_v48  ;;  %vm1260_vm14 = vweird.f32 %v1559_v52 }
 0xa6b   :  { %v1244_v56 = vsub.f32 1.5, %v1243_v53  ;;  %vm1261_vm3 = vmor %vm1259_vm1, %vm1260_vm14 }
 0xa6c   :  { %v1256_v57 = vsub.f32 1.0, %v1255_v54 }
 0xa6d   :  { %v1245_v59 = vmul.f32 %v1557_v49, %v1244_v56 }
 0xa6e   :  { %v1257_v62 = vmul.f32 %v1559_v52, %v1256_v57 }
 0xa6f   :  { %v1246_v3 = vmul.f32 %v1245_v59, %v1227_v45 }
 0xa70   :  { %v1258_v5 = vadd.f32 %v1559_v52, %v1257_v62 }
 0xa71   :  { %v1248_v7 = vsel %vm1247_vm15, %v1227_v45, %v1246_v3 }
 0xa72   :  { %v1262_v11 = vsel %vm1261_vm3, %v1559_v52, %v1258_v5  ;;  %v1251_v15 = vsel %vm1249_vm2, %v1250_v4, %v1248_v7 }
 0xa73   :  { %v1267_v16 = vsel %vm1264_vm4, %v1266_v8, %v1262_v11  ;;  %v1253_v17 = vadd.f32 1e-06, %v1251_v15 }
 0xa74   :  { %v1285_v20 = vmul.f32 %v1283_v9, %v1267_v16 }
 0xa75   :  { %1560 = vrcp.f32 %v1253_v17  ;;  %v1279_v26 = vand.u32 2147483648, %v1253_v17  ;;  %v1277_v12 = vand.u32 2147483647, %v1253_v17  ;;  %vm1273_vm6 = vweird.f32 %v1253_v17 }
 0xa76   :  { %v1288_v0 = vadd.f32 %v1517_v14, %v1285_v20 }
 0xa77   :  { %v1280_v29 = vor.u32 1.1754944e-38, %v1279_v26  ;;  %vm1278_vm8 = vcmp.eq.f32.partialorder %v1277_v12, 8.507059e+37 }
 0xa78   :  { %1440 = vmatmul.msk.f32.vlgmr.msra.gmra.mxu0 %vm269_vm0, %v1288_v0 }
 0xa7b   :  { %v1561_v22 = vpop.eup %1560 }
 0xa7c   :  { %v1269_v2 = vmul.f32 %v1561_v22, %v1253_v17  ;;  %vm1274_vm5 = vweird.f32 %v1561_v22 }
 0xa7d   :  { %vm1275_vm7 = vmor %vm1273_vm6, %vm1274_vm5 }
 0xa7e   :  { %v1270_v25 = vsub.f32 1.0, %v1269_v2 }
 0xa80   :  { %v1271_v27 = vmul.f32 %v1561_v22, %v1270_v25 }
 0xa82   :  { %v1272_v21 = vadd.f32 %v1561_v22, %v1271_v27 }
 0xa84   :  { %v1276_v28 = vsel %vm1275_vm7, %v1561_v22, %v1272_v21 }
 0xa85   :  { %v1281_v30 = vsel %vm1278_vm8, %v1280_v29, %v1276_v28 }
 0xa86   :  { %v1286_v31 = vmul.f32 %v1284_v13, %v1281_v30 }
 0xa88   :  { %v1289_v32 = vadd.f32 %v1517_v14, %v1286_v31 }
 0xa8a   :  { %1441 = vmatmul.msk.f32.gmra.mxu0 %vm269_vm0, %v1289_v32 }
 0xaf5   :  { %v1321_v37 = vpop.f32.mrf.mxu0 }
 0xaf6   :  { %v1322_v38 = vadd.f32 %v1518_v24, %v1321_v37 }
 0xaf8   :  { %v1327_v10 = vmax.f32 %v1322_v38, 0.0 }
 0xafa   :  { %1442 = vmatmul.msk.f32.vlgmr.msrb.gmra.mxu3 %vm1337_vm9, %v1327_v10 }
 0xb07   :  { %v1324_v39 = vpop.f32.mrf.mxu0 }
 0xb08   :  { %v1325_v40 = vadd.f32 %v1518_v24, %v1324_v39 }
 0xb0a   :  { %v1328_v34 = vmax.f32 %v1325_v40, 0.0 }
 0xb0c   :  { %1443 = vmatmul.msk.f32.gmra.mxu3 %vm1337_vm9, %v1328_v34 }
 0xb7d   :  { %v1361_v42 = vpop.f32.mrf.mxu3 }
 0xb7e   :  { %v1367_v45 = vadd.f32 %v1361_v42, %v2355_v19 }
 0xb80   :  { %v1373_v46 = vadd.f32 %v1519_v41, %v1367_v45 }
 0xb82   :  { %1375 = vst.msk [vmem:[#allocation25] sm:$0xff] %vm269_vm0, %v1373_v46 }
 0xb8f   :  { %v1364_v44 = vpop.f32.mrf.mxu3 }
 0xb90   :  { %v1368_v35 = vadd.f32 %v1364_v44, %v2360_v23 }
 0xb92   :  { %v1374_v47 = vadd.f32 %v1519_v41, %v1368_v35 }
 0xb94   :  { %1376 = vst.msk [vmem:[#allocation25 + $0x8] sm:$0xff] %vm269_vm0, %v1374_v47 }
 0xb95   :  { %1389 = dma.vmem_to_hbm [thread:$0]  %s1382_s20, 256, %s1384_s5, [#allocation7], %s1891_s3, %s1891_s3, %s1892_s25  }
 0xb96   :  { %1888 = dma.done.wait [#allocation7], 256  }
 0xb97   :  { %1889 = vsyncadd [#allocation7], 4294967040 }
 0xb98   :  { %1394 = vsyncpa [#allocation6], 1 }
 0xb99   :  { %1395 = vsyncpa [#allocation9], 1 }
 0xb9a   :  { %1396 = vsyncpa [#allocation12], 1 }
 0xb9b   :  { %1397 = vsyncpa [#allocation15], 1 }
 0xb9c   :  { %1398 = vsyncpa [#allocation18], 1 }
 0xb9d   :  { %1399 = vsyncpa [#allocation21], 1 }
 0xb9e   :  { %1400 = vsyncpa [#allocation24], 1 }
 0xb9f   :  { %1401 = vsyncpa [#allocation7], 1 }

</bundles_post_ra>
